<compile_context>
chip_gen: v7x
topology: tpu7x:2x2x1
jax: 0.10.0
libtpu: 0.0.40
codegen_flags: <defaults>
</compile_context>

<pallas_src>
import functools

import jax
import jax.numpy as jnp
from jax.experimental import pallas as pl
from jax.experimental.pallas import tpu as pltpu


# ----------------------------- in-kernel helpers -----------------------------

def _layer_norm(x, gamma, beta, eps=1e-5):
    # PyTorch nn.LayerNorm: biased variance, eps inside sqrt. f32 math.
    mean = jnp.mean(x, axis=-1, keepdims=True)
    var = jnp.mean((x - mean) ** 2, axis=-1, keepdims=True)
    return (x - mean) * jax.lax.rsqrt(var + eps) * gamma + beta


def _mha(x_q, x_kv, mask, n_head, d_k, d_v,
         wq, bq, wk, bk, wv, bv, wo, bo, gamma, beta):
    """Multi-head attention on one batch element; heads batched in one einsum.

    x_q:  (Lq, d_model) f32    x_kv: (Lk, d_model) f32
    mask: (Lq, Lk) f32, 1.0 == masked out
    returns (out (Lq, d_model) f32, attn (n_head, Lq, Lk) f32)
    """
    f32, bf16 = jnp.float32, jnp.bfloat16
    residual = x_q

    # Projections: bf16 MXU operands, f32 accumulate, f32 bias add.
    q = jnp.dot(x_q.astype(bf16), wq, preferred_element_type=f32) + bq
    k = jnp.dot(x_kv.astype(bf16), wk, preferred_element_type=f32) + bk
    v = jnp.dot(x_kv.astype(bf16), wv, preferred_element_type=f32) + bv
    q = q * jnp.float32(1.0 / (d_k ** 0.5))      # fold scale into q (smaller than scores)

    # Head-batched layout (n_head, L, d) -- one einsum per stage instead of a
    # per-head loop of tiny matmuls.
    qh = jnp.stack([q[:, h * d_k:(h + 1) * d_k] for h in range(n_head)], axis=0)
    kh = jnp.stack([k[:, h * d_k:(h + 1) * d_k] for h in range(n_head)], axis=0)
    vh = jnp.stack([v[:, h * d_v:(h + 1) * d_v] for h in range(n_head)], axis=0)

    s = jnp.einsum('hqd,hkd->hqk', qh.astype(bf16), kh.astype(bf16),
                   preferred_element_type=f32)               # (H, Lq, Lk)
    # Additive mask: avoids inf - inf = NaN for fully masked rows.
    s = s + mask[None, :, :] * jnp.float32(-1e9)
    s = s - jnp.max(s, axis=-1, keepdims=True)
    e = jnp.exp(s)
    p = e * pl.reciprocal(jnp.sum(e, axis=-1, keepdims=True), approx=True)

    o = jnp.einsum('hqk,hkd->hqd', p.astype(bf16), vh.astype(bf16),
                   preferred_element_type=f32)               # (H, Lq, d_v)
    cat = jnp.concatenate([o[h] for h in range(n_head)], axis=-1)  # (Lq, H*d_v)

    out = jnp.dot(cat.astype(bf16), wo, preferred_element_type=f32) + bo
    out = _layer_norm(out + residual, gamma, beta)
    return out, p


# ------------------------------ fused kernel ---------------------------------

def decoder_layer_kernel(n_head, d_k, d_v,
                         x_ref, enc_ref, smask_ref, emask_ref, npad_ref,
                         # self-attention params
                         s_wq, s_bq, s_wk, s_bk, s_wv, s_bv, s_wo, s_bo, s_g, s_b,
                         # enc-dec attention params
                         e_wq, e_bq, e_wk, e_bk, e_wv, e_bv, e_wo, e_bo, e_g, e_b,
                         # position-wise FFN params
                         f_w1, f_b1, f_w2, f_b2, f_g, f_b,
                         # outputs
                         out_ref, slf_attn_ref, enc_attn_ref):
    f32, bf16 = jnp.float32, jnp.bfloat16
    x = x_ref[0]                 # (Lq, d_model) f32
    enc = enc_ref[0]             # (Lk, d_model) f32
    npad = npad_ref[0]           # (Lq, 1) f32

    # ---- stage 1: masked self-attention + non_pad mask ----
    y, p_slf = _mha(x, x, smask_ref[0], n_head, d_k, d_v,
                    s_wq[...], s_bq[...], s_wk[...], s_bk[...], s_wv[...], s_bv[...],
                    s_wo[...], s_bo[...], s_g[...], s_b[...])
    y = y * npad
    slf_attn_ref[0] = p_slf      # (n_head, Lq, Lq)

    # ---- stage 2: encoder-decoder attention + non_pad mask ----
    z, p_enc = _mha(y, enc, emask_ref[0], n_head, d_k, d_v,
                    e_wq[...], e_bq[...], e_wk[...], e_bk[...], e_wv[...], e_bv[...],
                    e_wo[...], e_bo[...], e_g[...], e_b[...])
    z = z * npad
    enc_attn_ref[0] = p_enc      # (n_head, Lq, Lk)

    # ---- stage 3: position-wise FFN (Conv1d k=1 == linear) + non_pad mask ----
    h = jnp.dot(z.astype(bf16), f_w1[...], preferred_element_type=f32) + f_b1[...]
    h = jnp.maximum(h, 0.0)      # ReLU
    w = jnp.dot(h.astype(bf16), f_w2[...], preferred_element_type=f32) + f_b2[...]
    w = _layer_norm(w + z, f_g[...], f_b[...])
    out_ref[0] = w * npad


# ------------------------------- wrapper --------------------------------------

def _full_spec(arr):
    nd = arr.ndim
    return pl.BlockSpec(arr.shape, lambda b, _nd=nd: (0,) * _nd)


def decoder_layer(dec_input, enc_output, non_pad_mask, slf_attn_mask,
                  dec_enc_attn_mask, params, n_head, d_k, d_v):
    B, Lq, d_model = dec_input.shape
    _, Lk, _ = enc_output.shape

    flat_params = tuple(params["slf_attn"]) + tuple(params["enc_attn"]) \
        + tuple(params["pos_ffn"])

    kern = functools.partial(decoder_layer_kernel, n_head, d_k, d_v)

    in_specs = [
        pl.BlockSpec((1, Lq, d_model), lambda b: (b, 0, 0)),   # dec_input
        pl.BlockSpec((1, Lk, d_model), lambda b: (b, 0, 0)),   # enc_output
        pl.BlockSpec((1, Lq, Lq), lambda b: (b, 0, 0)),        # slf_attn_mask
        pl.BlockSpec((1, Lq, Lk), lambda b: (b, 0, 0)),        # dec_enc_attn_mask
        pl.BlockSpec((1, Lq, 1), lambda b: (b, 0, 0)),         # non_pad_mask
    ] + [_full_spec(p) for p in flat_params]                   # grid-invariant weights

    out_specs = (
        pl.BlockSpec((1, Lq, d_model), lambda b: (b, 0, 0)),
        pl.BlockSpec((1, n_head, Lq, Lq), lambda b: (b, 0, 0, 0)),
        pl.BlockSpec((1, n_head, Lq, Lk), lambda b: (b, 0, 0, 0)),
    )

    dec_out, slf4, enc4 = pl.pallas_call(
        kern,
        out_shape=(
            jax.ShapeDtypeStruct((B, Lq, d_model), jnp.float32),
            jax.ShapeDtypeStruct((B, n_head, Lq, Lq), jnp.float32),
            jax.ShapeDtypeStruct((B, n_head, Lq, Lk), jnp.float32),
        ),
        grid=(B,),
        in_specs=in_specs,
        out_specs=out_specs,
        compiler_params=pltpu.CompilerParams(
            dimension_semantics=("parallel",)),
    )(dec_input, enc_output, slf_attn_mask, dec_enc_attn_mask, non_pad_mask,
      *flat_params)

    # PyTorch MultiHeadAttention returns attn as (n_head * B, Lq, Lk), head-major.
    dec_slf_attn = jnp.transpose(slf4, (1, 0, 2, 3)).reshape(n_head * B, Lq, Lq)
    dec_enc_attn = jnp.transpose(enc4, (1, 0, 2, 3)).reshape(n_head * B, Lq, Lk)
    return dec_out, dec_slf_attn, dec_enc_attn


# ------------------------------ parameter init --------------------------------

def init_decoder_params(key, d_model, d_inner, n_head, d_k, d_v):
    bf16, f32 = jnp.bfloat16, jnp.float32

    def mha_params(k):
        ks = jax.random.split(k, 8)
        s = 0.1
        return (
            (s * jax.random.normal(ks[0], (d_model, n_head * d_k), f32)).astype(bf16),
            s * jax.random.normal(ks[1], (1, n_head * d_k), f32),
            (s * jax.random.normal(ks[2], (d_model, n_head * d_k), f32)).astype(bf16),
            s * jax.random.normal(ks[3], (1, n_head * d_k), f32),
            (s * jax.random.normal(ks[4], (d_model, n_head * d_v), f32)).astype(bf16),
            s * jax.random.normal(ks[5], (1, n_head * d_v), f32),
            (s * jax.random.normal(ks[6], (n_head * d_v, d_model), f32)).astype(bf16),
            s * jax.random.normal(ks[7], (1, d_model), f32),
            jnp.ones((1, d_model), f32),    # LayerNorm gamma
            jnp.zeros((1, d_model), f32),   # LayerNorm beta
        )

    def ffn_params(k):
        ks = jax.random.split(k, 4)
        s = 0.1
        return (
            (s * jax.random.normal(ks[0], (d_model, d_inner), f32)).astype(bf16),  # w_1
            s * jax.random.normal(ks[1], (1, d_inner), f32),
            (s * jax.random.normal(ks[2], (d_inner, d_model), f32)).astype(bf16),  # w_2
            s * jax.random.normal(ks[3], (1, d_model), f32),
            jnp.ones((1, d_model), f32),
            jnp.zeros((1, d_model), f32),
        )

    k1, k2, k3 = jax.random.split(key, 3)
    return {"slf_attn": mha_params(k1),
            "enc_attn": mha_params(k2),
            "pos_ffn": ffn_params(k3)}


# ------------------------------------ main ------------------------------------

if __name__ == "__main__":
    d_model, d_inner, n_head, d_k, d_v = 32, 64, 4, 8, 8
    B, Lq, Lk = 2, 8, 16

    key = jax.random.PRNGKey(0)
    kp, kd, ke = jax.random.split(key, 3)
    params = init_decoder_params(kp, d_model, d_inner, n_head, d_k, d_v)

    dec_input = jax.random.normal(kd, (B, Lq, d_model), jnp.float32)
    enc_output = jax.random.normal(ke, (B, Lk, d_model), jnp.float32)

    # non_pad_mask: 1 for real q tokens, 0 for padding (batch 1 has 2 pad tokens)
    non_pad = jnp.ones((B, Lq, 1), jnp.float32)
    non_pad = non_pad.at[1, Lq - 2:, 0].set(0.0)

    # slf_attn_mask: 1.0 == masked (future tokens, causal)
    causal = jnp.triu(jnp.ones((Lq, Lq), jnp.float32), k=1)
    slf_attn_mask = jnp.broadcast_to(causal, (B, Lq, Lq))

    # dec_enc_attn_mask: mask out last 4 encoder tokens for batch 1
    dec_enc_mask = jnp.zeros((B, Lq, Lk), jnp.float32)
    dec_enc_mask = dec_enc_mask.at[1, :, Lk - 4:].set(1.0)

    dec_out, slf_attn, enc_attn = jax.jit(
        functools.partial(decoder_layer, n_head=n_head, d_k=d_k, d_v=d_v)
    )(dec_input, enc_output, non_pad, slf_attn_mask, dec_enc_mask, params)
    jax.block_until_ready((dec_out, slf_attn, enc_attn))

    # basic sanity: shapes, finiteness, attention rows normalized
    assert dec_out.shape == (B, Lq, d_model)
    assert slf_attn.shape == (n_head * B, Lq, Lq)
    assert enc_attn.shape == (n_head * B, Lq, Lk)
    assert bool(jnp.all(jnp.isfinite(dec_out)))
    assert bool(jnp.all(jnp.isfinite(slf_attn)))
    assert bool(jnp.all(jnp.isfinite(enc_attn)))
    # approx reciprocal in softmax -> allow a slightly loose tolerance
    assert bool(jnp.allclose(jnp.sum(slf_attn, axis=-1), 1.0, atol=2e-2))
    assert bool(jnp.allclose(jnp.sum(enc_attn, axis=-1), 1.0, atol=2e-2))

    # TODO(synk): training-mode dropout (pltpu.prng_*) not implemented; eval-mode
    # identity semantics are used, matching model.eval().

    print("KERNEL_OK")
</pallas_src>

<mosaic_0001>
module attributes {stable_mosaic.version = 11 : i64} {
  func.func @decoder_layer_kernel(%arg0: i32, %arg1: memref<1x8x32xf32, #tpu.memory_space<vmem>>, %arg2: memref<1x16x32xf32, #tpu.memory_space<vmem>>, %arg3: memref<1x8x8xf32, #tpu.memory_space<vmem>>, %arg4: memref<1x8x16xf32, #tpu.memory_space<vmem>>, %arg5: memref<1x8x1xf32, #tpu.memory_space<vmem>>, %arg6: memref<32x32xbf16, #tpu.memory_space<vmem>>, %arg7: memref<1x32xf32, #tpu.memory_space<vmem>>, %arg8: memref<32x32xbf16, #tpu.memory_space<vmem>>, %arg9: memref<1x32xf32, #tpu.memory_space<vmem>>, %arg10: memref<32x32xbf16, #tpu.memory_space<vmem>>, %arg11: memref<1x32xf32, #tpu.memory_space<vmem>>, %arg12: memref<32x32xbf16, #tpu.memory_space<vmem>>, %arg13: memref<1x32xf32, #tpu.memory_space<vmem>>, %arg14: memref<1x32xf32, #tpu.memory_space<vmem>>, %arg15: memref<1x32xf32, #tpu.memory_space<vmem>>, %arg16: memref<32x32xbf16, #tpu.memory_space<vmem>>, %arg17: memref<1x32xf32, #tpu.memory_space<vmem>>, %arg18: memref<32x32xbf16, #tpu.memory_space<vmem>>, %arg19: memref<1x32xf32, #tpu.memory_space<vmem>>, %arg20: memref<32x32xbf16, #tpu.memory_space<vmem>>, %arg21: memref<1x32xf32, #tpu.memory_space<vmem>>, %arg22: memref<32x32xbf16, #tpu.memory_space<vmem>>, %arg23: memref<1x32xf32, #tpu.memory_space<vmem>>, %arg24: memref<1x32xf32, #tpu.memory_space<vmem>>, %arg25: memref<1x32xf32, #tpu.memory_space<vmem>>, %arg26: memref<32x64xbf16, #tpu.memory_space<vmem>>, %arg27: memref<1x64xf32, #tpu.memory_space<vmem>>, %arg28: memref<64x32xbf16, #tpu.memory_space<vmem>>, %arg29: memref<1x32xf32, #tpu.memory_space<vmem>>, %arg30: memref<1x32xf32, #tpu.memory_space<vmem>>, %arg31: memref<1x32xf32, #tpu.memory_space<vmem>>, %arg32: memref<1x8x32xf32, #tpu.memory_space<vmem>>, %arg33: memref<1x4x8x8xf32, #tpu.memory_space<vmem>>, %arg34: memref<1x4x8x16xf32, #tpu.memory_space<vmem>>) attributes {dimension_semantics = [#tpu.dimension_semantics<parallel>], iteration_bounds = array<i64: 2>, scalar_prefetch = 0 : i64, scratch_operands = 0 : i64, tpu.core_type = #tpu.core_type<tc>, window_params = [{transform_indices = @transform_0, window_bounds = array<i64: 1, 8, 32>}, {transform_indices = @transform_1, window_bounds = array<i64: 1, 16, 32>}, {transform_indices = @transform_2, window_bounds = array<i64: 1, 8, 8>}, {transform_indices = @transform_3, window_bounds = array<i64: 1, 8, 16>}, {transform_indices = @transform_4, window_bounds = array<i64: 1, 8, 1>}, {pipeline_mode = #tpu.pipeline_mode<synchronous>, transform_indices = @transform_5, window_bounds = array<i64: 32, 32>}, {pipeline_mode = #tpu.pipeline_mode<synchronous>, transform_indices = @transform_6, window_bounds = array<i64: 1, 32>}, {pipeline_mode = #tpu.pipeline_mode<synchronous>, transform_indices = @transform_7, window_bounds = array<i64: 32, 32>}, {pipeline_mode = #tpu.pipeline_mode<synchronous>, transform_indices = @transform_8, window_bounds = array<i64: 1, 32>}, {pipeline_mode = #tpu.pipeline_mode<synchronous>, transform_indices = @transform_9, window_bounds = array<i64: 32, 32>}, {pipeline_mode = #tpu.pipeline_mode<synchronous>, transform_indices = @transform_10, window_bounds = array<i64: 1, 32>}, {pipeline_mode = #tpu.pipeline_mode<synchronous>, transform_indices = @transform_11, window_bounds = array<i64: 32, 32>}, {pipeline_mode = #tpu.pipeline_mode<synchronous>, transform_indices = @transform_12, window_bounds = array<i64: 1, 32>}, {pipeline_mode = #tpu.pipeline_mode<synchronous>, transform_indices = @transform_13, window_bounds = array<i64: 1, 32>}, {pipeline_mode = #tpu.pipeline_mode<synchronous>, transform_indices = @transform_14, window_bounds = array<i64: 1, 32>}, {pipeline_mode = #tpu.pipeline_mode<synchronous>, transform_indices = @transform_15, window_bounds = array<i64: 32, 32>}, {pipeline_mode = #tpu.pipeline_mode<synchronous>, transform_indices = @transform_16, window_bounds = array<i64: 1, 32>}, {pipeline_mode = #tpu.pipeline_mode<synchronous>, transform_indices = @transform_17, window_bounds = array<i64: 32, 32>}, {pipeline_mode = #tpu.pipeline_mode<synchronous>, transform_indices = @transform_18, window_bounds = array<i64: 1, 32>}, {pipeline_mode = #tpu.pipeline_mode<synchronous>, transform_indices = @transform_19, window_bounds = array<i64: 32, 32>}, {pipeline_mode = #tpu.pipeline_mode<synchronous>, transform_indices = @transform_20, window_bounds = array<i64: 1, 32>}, {pipeline_mode = #tpu.pipeline_mode<synchronous>, transform_indices = @transform_21, window_bounds = array<i64: 32, 32>}, {pipeline_mode = #tpu.pipeline_mode<synchronous>, transform_indices = @transform_22, window_bounds = array<i64: 1, 32>}, {pipeline_mode = #tpu.pipeline_mode<synchronous>, transform_indices = @transform_23, window_bounds = array<i64: 1, 32>}, {pipeline_mode = #tpu.pipeline_mode<synchronous>, transform_indices = @transform_24, window_bounds = array<i64: 1, 32>}, {pipeline_mode = #tpu.pipeline_mode<synchronous>, transform_indices = @transform_25, window_bounds = array<i64: 32, 64>}, {pipeline_mode = #tpu.pipeline_mode<synchronous>, transform_indices = @transform_26, window_bounds = array<i64: 1, 64>}, {pipeline_mode = #tpu.pipeline_mode<synchronous>, transform_indices = @transform_27, window_bounds = array<i64: 64, 32>}, {pipeline_mode = #tpu.pipeline_mode<synchronous>, transform_indices = @transform_28, window_bounds = array<i64: 1, 32>}, {pipeline_mode = #tpu.pipeline_mode<synchronous>, transform_indices = @transform_29, window_bounds = array<i64: 1, 32>}, {pipeline_mode = #tpu.pipeline_mode<synchronous>, transform_indices = @transform_30, window_bounds = array<i64: 1, 32>}, {transform_indices = @transform_31, window_bounds = array<i64: 1, 8, 32>}, {transform_indices = @transform_32, window_bounds = array<i64: 1, 4, 8, 8>}, {transform_indices = @transform_33, window_bounds = array<i64: 1, 4, 8, 16>}]} {
    %c0 = arith.constant 0 : index
    %c0_0 = arith.constant 0 : index
    %c0_1 = arith.constant 0 : index
    %0 = vector.load %arg1[%c0, %c0_0, %c0_1] : memref<1x8x32xf32, #tpu.memory_space<vmem>>, vector<1x8x32xf32>
    %1 = vector.shape_cast %0 : vector<1x8x32xf32> to vector<8x32xf32>
    %c0_2 = arith.constant 0 : index
    %c0_3 = arith.constant 0 : index
    %c0_4 = arith.constant 0 : index
    %2 = vector.load %arg2[%c0_2, %c0_3, %c0_4] : memref<1x16x32xf32, #tpu.memory_space<vmem>>, vector<1x16x32xf32>
    %3 = vector.shape_cast %2 : vector<1x16x32xf32> to vector<16x32xf32>
    %c0_5 = arith.constant 0 : index
    %c0_6 = arith.constant 0 : index
    %c0_7 = arith.constant 0 : index
    %4 = vector.load %arg5[%c0_5, %c0_6, %c0_7] : memref<1x8x1xf32, #tpu.memory_space<vmem>>, vector<1x8x1xf32>
    %5 = vector.shape_cast %4 : vector<1x8x1xf32> to vector<8x1xf32>
    %c0_8 = arith.constant 0 : index
    %c0_9 = arith.constant 0 : index
    %c0_10 = arith.constant 0 : index
    %6 = vector.load %arg3[%c0_8, %c0_9, %c0_10] : memref<1x8x8xf32, #tpu.memory_space<vmem>>, vector<1x8x8xf32>
    %7 = vector.shape_cast %6 : vector<1x8x8xf32> to vector<8x8xf32>
    %c0_11 = arith.constant 0 : index
    %c0_12 = arith.constant 0 : index
    %8 = vector.load %arg6[%c0_11, %c0_12] : memref<32x32xbf16, #tpu.memory_space<vmem>>, vector<32x32xbf16>
    %c0_13 = arith.constant 0 : index
    %c0_14 = arith.constant 0 : index
    %9 = vector.load %arg7[%c0_13, %c0_14] : memref<1x32xf32, #tpu.memory_space<vmem>>, vector<1x32xf32>
    %c0_15 = arith.constant 0 : index
    %c0_16 = arith.constant 0 : index
    %10 = vector.load %arg8[%c0_15, %c0_16] : memref<32x32xbf16, #tpu.memory_space<vmem>>, vector<32x32xbf16>
    %c0_17 = arith.constant 0 : index
    %c0_18 = arith.constant 0 : index
    %11 = vector.load %arg9[%c0_17, %c0_18] : memref<1x32xf32, #tpu.memory_space<vmem>>, vector<1x32xf32>
    %c0_19 = arith.constant 0 : index
    %c0_20 = arith.constant 0 : index
    %12 = vector.load %arg10[%c0_19, %c0_20] : memref<32x32xbf16, #tpu.memory_space<vmem>>, vector<32x32xbf16>
    %c0_21 = arith.constant 0 : index
    %c0_22 = arith.constant 0 : index
    %13 = vector.load %arg11[%c0_21, %c0_22] : memref<1x32xf32, #tpu.memory_space<vmem>>, vector<1x32xf32>
    %c0_23 = arith.constant 0 : index
    %c0_24 = arith.constant 0 : index
    %14 = vector.load %arg12[%c0_23, %c0_24] : memref<32x32xbf16, #tpu.memory_space<vmem>>, vector<32x32xbf16>
    %c0_25 = arith.constant 0 : index
    %c0_26 = arith.constant 0 : index
    %15 = vector.load %arg13[%c0_25, %c0_26] : memref<1x32xf32, #tpu.memory_space<vmem>>, vector<1x32xf32>
    %c0_27 = arith.constant 0 : index
    %c0_28 = arith.constant 0 : index
    %16 = vector.load %arg14[%c0_27, %c0_28] : memref<1x32xf32, #tpu.memory_space<vmem>>, vector<1x32xf32>
    %c0_29 = arith.constant 0 : index
    %c0_30 = arith.constant 0 : index
    %17 = vector.load %arg15[%c0_29, %c0_30] : memref<1x32xf32, #tpu.memory_space<vmem>>, vector<1x32xf32>
    %18 = arith.truncf %1 : vector<8x32xf32> to vector<8x32xbf16>
    %cst = arith.constant dense<0.000000e+00> : vector<8x32xf32>
    %19 = tpu.matmul %18, %8, %cst {dimension_numbers = #tpu.dot_dimension_numbers<[1], [0], [0], [1], [0, 0, 1, 1], [], []>} : vector<8x32xbf16>, vector<32x32xbf16>, vector<8x32xf32> -> vector<8x32xf32>
    %20 = vector.broadcast %9 : vector<1x32xf32> to vector<8x32xf32>
    %21 = arith.addf %19, %20 : vector<8x32xf32>
    %22 = arith.truncf %1 : vector<8x32xf32> to vector<8x32xbf16>
    %cst_31 = arith.constant dense<0.000000e+00> : vector<8x32xf32>
    %23 = tpu.matmul %22, %10, %cst_31 {dimension_numbers = #tpu.dot_dimension_numbers<[1], [0], [0], [1], [0, 0, 1, 1], [], []>} : vector<8x32xbf16>, vector<32x32xbf16>, vector<8x32xf32> -> vector<8x32xf32>
    %24 = vector.broadcast %11 : vector<1x32xf32> to vector<8x32xf32>
    %25 = arith.addf %23, %24 : vector<8x32xf32>
    %26 = arith.truncf %1 : vector<8x32xf32> to vector<8x32xbf16>
    %cst_32 = arith.constant dense<0.000000e+00> : vector<8x32xf32>
    %27 = tpu.matmul %26, %12, %cst_32 {dimension_numbers = #tpu.dot_dimension_numbers<[1], [0], [0], [1], [0, 0, 1, 1], [], []>} : vector<8x32xbf16>, vector<32x32xbf16>, vector<8x32xf32> -> vector<8x32xf32>
    %28 = vector.broadcast %13 : vector<1x32xf32> to vector<8x32xf32>
    %29 = arith.addf %27, %28 : vector<8x32xf32>
    %cst_33 = arith.constant 0.353553385 : f32
    %30 = vector.broadcast %cst_33 : f32 to vector<8x32xf32>
    %31 = arith.mulf %21, %30 : vector<8x32xf32>
    %32 = vector.extract_strided_slice %31 {offsets = [0, 0], sizes = [8, 8], strides = [1, 1]} : vector<8x32xf32> to vector<8x8xf32>
    %33 = vector.extract_strided_slice %31 {offsets = [0, 8], sizes = [8, 8], strides = [1, 1]} : vector<8x32xf32> to vector<8x8xf32>
    %34 = vector.extract_strided_slice %31 {offsets = [0, 16], sizes = [8, 8], strides = [1, 1]} : vector<8x32xf32> to vector<8x8xf32>
    %35 = vector.extract_strided_slice %31 {offsets = [0, 24], sizes = [8, 8], strides = [1, 1]} : vector<8x32xf32> to vector<8x8xf32>
    %36 = vector.shape_cast %32 : vector<8x8xf32> to vector<1x8x8xf32>
    %37 = vector.shape_cast %33 : vector<8x8xf32> to vector<1x8x8xf32>
    %38 = vector.shape_cast %34 : vector<8x8xf32> to vector<1x8x8xf32>
    %39 = vector.shape_cast %35 : vector<8x8xf32> to vector<1x8x8xf32>
    %40 = tpu.concatenate %36, %37, %38, %39 in 0 : vector<1x8x8xf32>, vector<1x8x8xf32>, vector<1x8x8xf32>, vector<1x8x8xf32> -> vector<4x8x8xf32>
    %41 = vector.extract_strided_slice %25 {offsets = [0, 0], sizes = [8, 8], strides = [1, 1]} : vector<8x32xf32> to vector<8x8xf32>
    %42 = vector.extract_strided_slice %25 {offsets = [0, 8], sizes = [8, 8], strides = [1, 1]} : vector<8x32xf32> to vector<8x8xf32>
    %43 = vector.extract_strided_slice %25 {offsets = [0, 16], sizes = [8, 8], strides = [1, 1]} : vector<8x32xf32> to vector<8x8xf32>
    %44 = vector.extract_strided_slice %25 {offsets = [0, 24], sizes = [8, 8], strides = [1, 1]} : vector<8x32xf32> to vector<8x8xf32>
    %45 = vector.shape_cast %41 : vector<8x8xf32> to vector<1x8x8xf32>
    %46 = vector.shape_cast %42 : vector<8x8xf32> to vector<1x8x8xf32>
    %47 = vector.shape_cast %43 : vector<8x8xf32> to vector<1x8x8xf32>
    %48 = vector.shape_cast %44 : vector<8x8xf32> to vector<1x8x8xf32>
    %49 = tpu.concatenate %45, %46, %47, %48 in 0 : vector<1x8x8xf32>, vector<1x8x8xf32>, vector<1x8x8xf32>, vector<1x8x8xf32> -> vector<4x8x8xf32>
    %50 = vector.extract_strided_slice %29 {offsets = [0, 0], sizes = [8, 8], strides = [1, 1]} : vector<8x32xf32> to vector<8x8xf32>
    %51 = vector.extract_strided_slice %29 {offsets = [0, 8], sizes = [8, 8], strides = [1, 1]} : vector<8x32xf32> to vector<8x8xf32>
    %52 = vector.extract_strided_slice %29 {offsets = [0, 16], sizes = [8, 8], strides = [1, 1]} : vector<8x32xf32> to vector<8x8xf32>
    %53 = vector.extract_strided_slice %29 {offsets = [0, 24], sizes = [8, 8], strides = [1, 1]} : vector<8x32xf32> to vector<8x8xf32>
    %54 = vector.shape_cast %50 : vector<8x8xf32> to vector<1x8x8xf32>
    %55 = vector.shape_cast %51 : vector<8x8xf32> to vector<1x8x8xf32>
    %56 = vector.shape_cast %52 : vector<8x8xf32> to vector<1x8x8xf32>
    %57 = vector.shape_cast %53 : vector<8x8xf32> to vector<1x8x8xf32>
    %58 = tpu.concatenate %54, %55, %56, %57 in 0 : vector<1x8x8xf32>, vector<1x8x8xf32>, vector<1x8x8xf32>, vector<1x8x8xf32> -> vector<4x8x8xf32>
    %59 = arith.truncf %40 : vector<4x8x8xf32> to vector<4x8x8xbf16>
    %60 = arith.truncf %49 : vector<4x8x8xf32> to vector<4x8x8xbf16>
    "tpu.trace_start"() <{level = 10 : i32, message = "hqd,hkd->hqk"}> : () -> ()
    %cst_34 = arith.constant dense<0.000000e+00> : vector<4x8x8xf32>
    %61 = tpu.matmul %59, %60, %cst_34 {dimension_numbers = #tpu.dot_dimension_numbers<[2], [2], [1], [1], [0, 0, 0, 1, 1, 1], [0], [0]>} : vector<4x8x8xbf16>, vector<4x8x8xbf16>, vector<4x8x8xf32> -> vector<4x8x8xf32>
    "tpu.trace_stop"() : () -> ()
    %62 = vector.shape_cast %7 : vector<8x8xf32> to vector<1x8x8xf32>
    %cst_35 = arith.constant -1.000000e+09 : f32
    %63 = vector.broadcast %cst_35 : f32 to vector<1x8x8xf32>
    %64 = arith.mulf %62, %63 : vector<1x8x8xf32>
    %65 = vector.broadcast %64 : vector<1x8x8xf32> to vector<4x8x8xf32>
    %66 = arith.addf %61, %65 : vector<4x8x8xf32>
    %cst_36 = arith.constant dense<0xFF800000> : vector<4x8xf32>
    %67 = vector.multi_reduction <maximumf>, %66, %cst_36 [2] : vector<4x8x8xf32> to vector<4x8xf32>
    %68 = vector.shape_cast %67 : vector<4x8xf32> to vector<4x8x1xf32>
    %69 = vector.broadcast %68 : vector<4x8x1xf32> to vector<4x8x8xf32>
    %70 = arith.subf %66, %69 : vector<4x8x8xf32>
    %71 = math.exp %70 : vector<4x8x8xf32>
    %cst_37 = arith.constant dense<0.000000e+00> : vector<4x8xf32>
    %72 = vector.multi_reduction <add>, %71, %cst_37 [2] : vector<4x8x8xf32> to vector<4x8xf32>
    %73 = vector.shape_cast %72 : vector<4x8xf32> to vector<4x8x1xf32>
    %74 = tpu.reciprocal %73 {approx = true} : vector<4x8x1xf32> -> vector<4x8x1xf32>
    %75 = vector.broadcast %74 : vector<4x8x1xf32> to vector<4x8x8xf32>
    %76 = arith.mulf %71, %75 : vector<4x8x8xf32>
    %77 = arith.truncf %76 : vector<4x8x8xf32> to vector<4x8x8xbf16>
    %78 = arith.truncf %58 : vector<4x8x8xf32> to vector<4x8x8xbf16>
    "tpu.trace_start"() <{level = 10 : i32, message = "hqk,hkd->hqd"}> : () -> ()
    %cst_38 = arith.constant dense<0.000000e+00> : vector<4x8x8xf32>
    %79 = tpu.matmul %77, %78, %cst_38 {dimension_numbers = #tpu.dot_dimension_numbers<[2], [1], [1], [2], [0, 0, 0, 1, 1, 2], [0], [0]>} : vector<4x8x8xbf16>, vector<4x8x8xbf16>, vector<4x8x8xf32> -> vector<4x8x8xf32>
    "tpu.trace_stop"() : () -> ()
    %80 = vector.extract_strided_slice %79 {offsets = [0, 0, 0], sizes = [1, 8, 8], strides = [1, 1, 1]} : vector<4x8x8xf32> to vector<1x8x8xf32>
    %81 = vector.shape_cast %80 : vector<1x8x8xf32> to vector<8x8xf32>
    %82 = vector.extract_strided_slice %79 {offsets = [1, 0, 0], sizes = [1, 8, 8], strides = [1, 1, 1]} : vector<4x8x8xf32> to vector<1x8x8xf32>
    %83 = vector.shape_cast %82 : vector<1x8x8xf32> to vector<8x8xf32>
    %84 = vector.extract_strided_slice %79 {offsets = [2, 0, 0], sizes = [1, 8, 8], strides = [1, 1, 1]} : vector<4x8x8xf32> to vector<1x8x8xf32>
    %85 = vector.shape_cast %84 : vector<1x8x8xf32> to vector<8x8xf32>
    %86 = vector.extract_strided_slice %79 {offsets = [3, 0, 0], sizes = [1, 8, 8], strides = [1, 1, 1]} : vector<4x8x8xf32> to vector<1x8x8xf32>
    %87 = vector.shape_cast %86 : vector<1x8x8xf32> to vector<8x8xf32>
    %88 = tpu.concatenate %81, %83, %85, %87 in 1 : vector<8x8xf32>, vector<8x8xf32>, vector<8x8xf32>, vector<8x8xf32> -> vector<8x32xf32>
    %89 = arith.truncf %88 : vector<8x32xf32> to vector<8x32xbf16>
    %cst_39 = arith.constant dense<0.000000e+00> : vector<8x32xf32>
    %90 = tpu.matmul %89, %14, %cst_39 {dimension_numbers = #tpu.dot_dimension_numbers<[1], [0], [0], [1], [0, 0, 1, 1], [], []>} : vector<8x32xbf16>, vector<32x32xbf16>, vector<8x32xf32> -> vector<8x32xf32>
    %91 = vector.broadcast %15 : vector<1x32xf32> to vector<8x32xf32>
    %92 = arith.addf %90, %91 : vector<8x32xf32>
    %93 = arith.addf %92, %1 : vector<8x32xf32>
    %cst_40 = arith.constant dense<0.000000e+00> : vector<8xf32>
    %94 = vector.multi_reduction <add>, %93, %cst_40 [1] : vector<8x32xf32> to vector<8xf32>
    %95 = vector.shape_cast %94 : vector<8xf32> to vector<8x1xf32>
    %cst_41 = arith.constant 3.200000e+01 : f32
    %96 = vector.broadcast %cst_41 : f32 to vector<8x1xf32>
    %97 = arith.divf %95, %96 : vector<8x1xf32>
    %98 = vector.broadcast %97 : vector<8x1xf32> to vector<8x32xf32>
    %99 = arith.subf %93, %98 : vector<8x32xf32>
    %100 = arith.mulf %99, %99 : vector<8x32xf32>
    %cst_42 = arith.constant dense<0.000000e+00> : vector<8xf32>
    %101 = vector.multi_reduction <add>, %100, %cst_42 [1] : vector<8x32xf32> to vector<8xf32>
    %102 = vector.shape_cast %101 : vector<8xf32> to vector<8x1xf32>
    %cst_43 = arith.constant 3.200000e+01 : f32
    %103 = vector.broadcast %cst_43 : f32 to vector<8x1xf32>
    %104 = arith.divf %102, %103 : vector<8x1xf32>
    %105 = vector.broadcast %97 : vector<8x1xf32> to vector<8x32xf32>
    %106 = arith.subf %93, %105 : vector<8x32xf32>
    %cst_44 = arith.constant 9.99999974E-6 : f32
    %107 = vector.broadcast %cst_44 : f32 to vector<8x1xf32>
    %108 = arith.addf %104, %107 : vector<8x1xf32>
    %109 = math.rsqrt %108 : vector<8x1xf32>
    %110 = vector.broadcast %109 : vector<8x1xf32> to vector<8x32xf32>
    %111 = arith.mulf %106, %110 : vector<8x32xf32>
    %112 = vector.broadcast %16 : vector<1x32xf32> to vector<8x32xf32>
    %113 = arith.mulf %111, %112 : vector<8x32xf32>
    %114 = vector.broadcast %17 : vector<1x32xf32> to vector<8x32xf32>
    %115 = arith.addf %113, %114 : vector<8x32xf32>
    %116 = vector.broadcast %5 : vector<8x1xf32> to vector<8x32xf32>
    %117 = arith.mulf %115, %116 : vector<8x32xf32>
    %c0_45 = arith.constant 0 : index
    %c0_46 = arith.constant 0 : index
    %c0_47 = arith.constant 0 : index
    %c0_48 = arith.constant 0 : index
    %118 = vector.load %arg33[%c0_45, %c0_46, %c0_47, %c0_48] : memref<1x4x8x8xf32, #tpu.memory_space<vmem>>, vector<1x4x8x8xf32>
    %119 = vector.shape_cast %118 : vector<1x4x8x8xf32> to vector<4x8x8xf32>
    %120 = vector.shape_cast %76 : vector<4x8x8xf32> to vector<1x4x8x8xf32>
    tpu.vector_store %arg33[%c0_45, %c0_46, %c0_47, %c0_48], %120 {strides = array<i32>} : memref<1x4x8x8xf32, #tpu.memory_space<vmem>>, vector<1x4x8x8xf32>,
    %c0_49 = arith.constant 0 : index
    %c0_50 = arith.constant 0 : index
    %c0_51 = arith.constant 0 : index
    %121 = vector.load %arg4[%c0_49, %c0_50, %c0_51] : memref<1x8x16xf32, #tpu.memory_space<vmem>>, vector<1x8x16xf32>
    %122 = vector.shape_cast %121 : vector<1x8x16xf32> to vector<8x16xf32>
    %c0_52 = arith.constant 0 : index
    %c0_53 = arith.constant 0 : index
    %123 = vector.load %arg16[%c0_52, %c0_53] : memref<32x32xbf16, #tpu.memory_space<vmem>>, vector<32x32xbf16>
    %c0_54 = arith.constant 0 : index
    %c0_55 = arith.constant 0 : index
    %124 = vector.load %arg17[%c0_54, %c0_55] : memref<1x32xf32, #tpu.memory_space<vmem>>, vector<1x32xf32>
    %c0_56 = arith.constant 0 : index
    %c0_57 = arith.constant 0 : index
    %125 = vector.load %arg18[%c0_56, %c0_57] : memref<32x32xbf16, #tpu.memory_space<vmem>>, vector<32x32xbf16>
    %c0_58 = arith.constant 0 : index
    %c0_59 = arith.constant 0 : index
    %126 = vector.load %arg19[%c0_58, %c0_59] : memref<1x32xf32, #tpu.memory_space<vmem>>, vector<1x32xf32>
    %c0_60 = arith.constant 0 : index
    %c0_61 = arith.constant 0 : index
    %127 = vector.load %arg20[%c0_60, %c0_61] : memref<32x32xbf16, #tpu.memory_space<vmem>>, vector<32x32xbf16>
    %c0_62 = arith.constant 0 : index
    %c0_63 = arith.constant 0 : index
    %128 = vector.load %arg21[%c0_62, %c0_63] : memref<1x32xf32, #tpu.memory_space<vmem>>, vector<1x32xf32>
    %c0_64 = arith.constant 0 : index
    %c0_65 = arith.constant 0 : index
    %129 = vector.load %arg22[%c0_64, %c0_65] : memref<32x32xbf16, #tpu.memory_space<vmem>>, vector<32x32xbf16>
    %c0_66 = arith.constant 0 : index
    %c0_67 = arith.constant 0 : index
    %130 = vector.load %arg23[%c0_66, %c0_67] : memref<1x32xf32, #tpu.memory_space<vmem>>, vector<1x32xf32>
    %c0_68 = arith.constant 0 : index
    %c0_69 = arith.constant 0 : index
    %131 = vector.load %arg24[%c0_68, %c0_69] : memref<1x32xf32, #tpu.memory_space<vmem>>, vector<1x32xf32>
    %c0_70 = arith.constant 0 : index
    %c0_71 = arith.constant 0 : index
    %132 = vector.load %arg25[%c0_70, %c0_71] : memref<1x32xf32, #tpu.memory_space<vmem>>, vector<1x32xf32>
    %133 = arith.truncf %117 : vector<8x32xf32> to vector<8x32xbf16>
    %cst_72 = arith.constant dense<0.000000e+00> : vector<8x32xf32>
    %134 = tpu.matmul %133, %123, %cst_72 {dimension_numbers = #tpu.dot_dimension_numbers<[1], [0], [0], [1], [0, 0, 1, 1], [], []>} : vector<8x32xbf16>, vector<32x32xbf16>, vector<8x32xf32> -> vector<8x32xf32>
    %135 = vector.broadcast %124 : vector<1x32xf32> to vector<8x32xf32>
    %136 = arith.addf %134, %135 : vector<8x32xf32>
    %137 = arith.truncf %3 : vector<16x32xf32> to vector<16x32xbf16>
    %cst_73 = arith.constant dense<0.000000e+00> : vector<16x32xf32>
    %138 = tpu.matmul %137, %125, %cst_73 {dimension_numbers = #tpu.dot_dimension_numbers<[1], [0], [0], [1], [0, 0, 1, 1], [], []>} : vector<16x32xbf16>, vector<32x32xbf16>, vector<16x32xf32> -> vector<16x32xf32>
    %139 = vector.broadcast %126 : vector<1x32xf32> to vector<16x32xf32>
    %140 = arith.addf %138, %139 : vector<16x32xf32>
    %141 = arith.truncf %3 : vector<16x32xf32> to vector<16x32xbf16>
    %cst_74 = arith.constant dense<0.000000e+00> : vector<16x32xf32>
    %142 = tpu.matmul %141, %127, %cst_74 {dimension_numbers = #tpu.dot_dimension_numbers<[1], [0], [0], [1], [0, 0, 1, 1], [], []>} : vector<16x32xbf16>, vector<32x32xbf16>, vector<16x32xf32> -> vector<16x32xf32>
    %143 = vector.broadcast %128 : vector<1x32xf32> to vector<16x32xf32>
    %144 = arith.addf %142, %143 : vector<16x32xf32>
    %cst_75 = arith.constant 0.353553385 : f32
    %145 = vector.broadcast %cst_75 : f32 to vector<8x32xf32>
    %146 = arith.mulf %136, %145 : vector<8x32xf32>
    %147 = vector.extract_strided_slice %146 {offsets = [0, 0], sizes = [8, 8], strides = [1, 1]} : vector<8x32xf32> to vector<8x8xf32>
    %148 = vector.extract_strided_slice %146 {offsets = [0, 8], sizes = [8, 8], strides = [1, 1]} : vector<8x32xf32> to vector<8x8xf32>
    %149 = vector.extract_strided_slice %146 {offsets = [0, 16], sizes = [8, 8], strides = [1, 1]} : vector<8x32xf32> to vector<8x8xf32>
    %150 = vector.extract_strided_slice %146 {offsets = [0, 24], sizes = [8, 8], strides = [1, 1]} : vector<8x32xf32> to vector<8x8xf32>
    %151 = vector.shape_cast %147 : vector<8x8xf32> to vector<1x8x8xf32>
    %152 = vector.shape_cast %148 : vector<8x8xf32> to vector<1x8x8xf32>
    %153 = vector.shape_cast %149 : vector<8x8xf32> to vector<1x8x8xf32>
    %154 = vector.shape_cast %150 : vector<8x8xf32> to vector<1x8x8xf32>
    %155 = tpu.concatenate %151, %152, %153, %154 in 0 : vector<1x8x8xf32>, vector<1x8x8xf32>, vector<1x8x8xf32>, vector<1x8x8xf32> -> vector<4x8x8xf32>
    %156 = vector.extract_strided_slice %140 {offsets = [0, 0], sizes = [16, 8], strides = [1, 1]} : vector<16x32xf32> to vector<16x8xf32>
    %157 = vector.extract_strided_slice %140 {offsets = [0, 8], sizes = [16, 8], strides = [1, 1]} : vector<16x32xf32> to vector<16x8xf32>
    %158 = vector.extract_strided_slice %140 {offsets = [0, 16], sizes = [16, 8], strides = [1, 1]} : vector<16x32xf32> to vector<16x8xf32>
    %159 = vector.extract_strided_slice %140 {offsets = [0, 24], sizes = [16, 8], strides = [1, 1]} : vector<16x32xf32> to vector<16x8xf32>
    %160 = vector.shape_cast %156 : vector<16x8xf32> to vector<1x16x8xf32>
    %161 = vector.shape_cast %157 : vector<16x8xf32> to vector<1x16x8xf32>
    %162 = vector.shape_cast %158 : vector<16x8xf32> to vector<1x16x8xf32>
    %163 = vector.shape_cast %159 : vector<16x8xf32> to vector<1x16x8xf32>
    %164 = tpu.concatenate %160, %161, %162, %163 in 0 : vector<1x16x8xf32>, vector<1x16x8xf32>, vector<1x16x8xf32>, vector<1x16x8xf32> -> vector<4x16x8xf32>
    %165 = vector.extract_strided_slice %144 {offsets = [0, 0], sizes = [16, 8], strides = [1, 1]} : vector<16x32xf32> to vector<16x8xf32>
    %166 = vector.extract_strided_slice %144 {offsets = [0, 8], sizes = [16, 8], strides = [1, 1]} : vector<16x32xf32> to vector<16x8xf32>
    %167 = vector.extract_strided_slice %144 {offsets = [0, 16], sizes = [16, 8], strides = [1, 1]} : vector<16x32xf32> to vector<16x8xf32>
    %168 = vector.extract_strided_slice %144 {offsets = [0, 24], sizes = [16, 8], strides = [1, 1]} : vector<16x32xf32> to vector<16x8xf32>
    %169 = vector.shape_cast %165 : vector<16x8xf32> to vector<1x16x8xf32>
    %170 = vector.shape_cast %166 : vector<16x8xf32> to vector<1x16x8xf32>
    %171 = vector.shape_cast %167 : vector<16x8xf32> to vector<1x16x8xf32>
    %172 = vector.shape_cast %168 : vector<16x8xf32> to vector<1x16x8xf32>
    %173 = tpu.concatenate %169, %170, %171, %172 in 0 : vector<1x16x8xf32>, vector<1x16x8xf32>, vector<1x16x8xf32>, vector<1x16x8xf32> -> vector<4x16x8xf32>
    %174 = arith.truncf %155 : vector<4x8x8xf32> to vector<4x8x8xbf16>
    %175 = arith.truncf %164 : vector<4x16x8xf32> to vector<4x16x8xbf16>
    "tpu.trace_start"() <{level = 10 : i32, message = "hqd,hkd->hqk"}> : () -> ()
    %cst_76 = arith.constant dense<0.000000e+00> : vector<4x8x16xf32>
    %176 = tpu.matmul %174, %175, %cst_76 {dimension_numbers = #tpu.dot_dimension_numbers<[2], [2], [1], [1], [0, 0, 0, 1, 1, 1], [0], [0]>} : vector<4x8x8xbf16>, vector<4x16x8xbf16>, vector<4x8x16xf32> -> vector<4x8x16xf32>
    "tpu.trace_stop"() : () -> ()
    %177 = vector.shape_cast %122 : vector<8x16xf32> to vector<1x8x16xf32>
    %cst_77 = arith.constant -1.000000e+09 : f32
    %178 = vector.broadcast %cst_77 : f32 to vector<1x8x16xf32>
    %179 = arith.mulf %177, %178 : vector<1x8x16xf32>
    %180 = vector.broadcast %179 : vector<1x8x16xf32> to vector<4x8x16xf32>
    %181 = arith.addf %176, %180 : vector<4x8x16xf32>
    %cst_78 = arith.constant dense<0xFF800000> : vector<4x8xf32>
    %182 = vector.multi_reduction <maximumf>, %181, %cst_78 [2] : vector<4x8x16xf32> to vector<4x8xf32>
    %183 = vector.shape_cast %182 : vector<4x8xf32> to vector<4x8x1xf32>
    %184 = vector.broadcast %183 : vector<4x8x1xf32> to vector<4x8x16xf32>
    %185 = arith.subf %181, %184 : vector<4x8x16xf32>
    %186 = math.exp %185 : vector<4x8x16xf32>
    %cst_79 = arith.constant dense<0.000000e+00> : vector<4x8xf32>
    %187 = vector.multi_reduction <add>, %186, %cst_79 [2] : vector<4x8x16xf32> to vector<4x8xf32>
    %188 = vector.shape_cast %187 : vector<4x8xf32> to vector<4x8x1xf32>
    %189 = tpu.reciprocal %188 {approx = true} : vector<4x8x1xf32> -> vector<4x8x1xf32>
    %190 = vector.broadcast %189 : vector<4x8x1xf32> to vector<4x8x16xf32>
    %191 = arith.mulf %186, %190 : vector<4x8x16xf32>
    %192 = arith.truncf %191 : vector<4x8x16xf32> to vector<4x8x16xbf16>
    %193 = arith.truncf %173 : vector<4x16x8xf32> to vector<4x16x8xbf16>
    "tpu.trace_start"() <{level = 10 : i32, message = "hqk,hkd->hqd"}> : () -> ()
    %cst_80 = arith.constant dense<0.000000e+00> : vector<4x8x8xf32>
    %194 = tpu.matmul %192, %193, %cst_80 {dimension_numbers = #tpu.dot_dimension_numbers<[2], [1], [1], [2], [0, 0, 0, 1, 1, 2], [0], [0]>} : vector<4x8x16xbf16>, vector<4x16x8xbf16>, vector<4x8x8xf32> -> vector<4x8x8xf32>
    "tpu.trace_stop"() : () -> ()
    %195 = vector.extract_strided_slice %194 {offsets = [0, 0, 0], sizes = [1, 8, 8], strides = [1, 1, 1]} : vector<4x8x8xf32> to vector<1x8x8xf32>
    %196 = vector.shape_cast %195 : vector<1x8x8xf32> to vector<8x8xf32>
    %197 = vector.extract_strided_slice %194 {offsets = [1, 0, 0], sizes = [1, 8, 8], strides = [1, 1, 1]} : vector<4x8x8xf32> to vector<1x8x8xf32>
    %198 = vector.shape_cast %197 : vector<1x8x8xf32> to vector<8x8xf32>
    %199 = vector.extract_strided_slice %194 {offsets = [2, 0, 0], sizes = [1, 8, 8], strides = [1, 1, 1]} : vector<4x8x8xf32> to vector<1x8x8xf32>
    %200 = vector.shape_cast %199 : vector<1x8x8xf32> to vector<8x8xf32>
    %201 = vector.extract_strided_slice %194 {offsets = [3, 0, 0], sizes = [1, 8, 8], strides = [1, 1, 1]} : vector<4x8x8xf32> to vector<1x8x8xf32>
    %202 = vector.shape_cast %201 : vector<1x8x8xf32> to vector<8x8xf32>
    %203 = tpu.concatenate %196, %198, %200, %202 in 1 : vector<8x8xf32>, vector<8x8xf32>, vector<8x8xf32>, vector<8x8xf32> -> vector<8x32xf32>
    %204 = arith.truncf %203 : vector<8x32xf32> to vector<8x32xbf16>
    %cst_81 = arith.constant dense<0.000000e+00> : vector<8x32xf32>
    %205 = tpu.matmul %204, %129, %cst_81 {dimension_numbers = #tpu.dot_dimension_numbers<[1], [0], [0], [1], [0, 0, 1, 1], [], []>} : vector<8x32xbf16>, vector<32x32xbf16>, vector<8x32xf32> -> vector<8x32xf32>
    %206 = vector.broadcast %130 : vector<1x32xf32> to vector<8x32xf32>
    %207 = arith.addf %205, %206 : vector<8x32xf32>
    %208 = arith.addf %207, %117 : vector<8x32xf32>
    %cst_82 = arith.constant dense<0.000000e+00> : vector<8xf32>
    %209 = vector.multi_reduction <add>, %208, %cst_82 [1] : vector<8x32xf32> to vector<8xf32>
    %210 = vector.shape_cast %209 : vector<8xf32> to vector<8x1xf32>
    %cst_83 = arith.constant 3.200000e+01 : f32
    %211 = vector.broadcast %cst_83 : f32 to vector<8x1xf32>
    %212 = arith.divf %210, %211 : vector<8x1xf32>
    %213 = vector.broadcast %212 : vector<8x1xf32> to vector<8x32xf32>
    %214 = arith.subf %208, %213 : vector<8x32xf32>
    %215 = arith.mulf %214, %214 : vector<8x32xf32>
    %cst_84 = arith.constant dense<0.000000e+00> : vector<8xf32>
    %216 = vector.multi_reduction <add>, %215, %cst_84 [1] : vector<8x32xf32> to vector<8xf32>
    %217 = vector.shape_cast %216 : vector<8xf32> to vector<8x1xf32>
    %cst_85 = arith.constant 3.200000e+01 : f32
    %218 = vector.broadcast %cst_85 : f32 to vector<8x1xf32>
    %219 = arith.divf %217, %218 : vector<8x1xf32>
    %220 = vector.broadcast %212 : vector<8x1xf32> to vector<8x32xf32>
    %221 = arith.subf %208, %220 : vector<8x32xf32>
    %cst_86 = arith.constant 9.99999974E-6 : f32
    %222 = vector.broadcast %cst_86 : f32 to vector<8x1xf32>
    %223 = arith.addf %219, %222 : vector<8x1xf32>
    %224 = math.rsqrt %223 : vector<8x1xf32>
    %225 = vector.broadcast %224 : vector<8x1xf32> to vector<8x32xf32>
    %226 = arith.mulf %221, %225 : vector<8x32xf32>
    %227 = vector.broadcast %131 : vector<1x32xf32> to vector<8x32xf32>
    %228 = arith.mulf %226, %227 : vector<8x32xf32>
    %229 = vector.broadcast %132 : vector<1x32xf32> to vector<8x32xf32>
    %230 = arith.addf %228, %229 : vector<8x32xf32>
    %231 = vector.broadcast %5 : vector<8x1xf32> to vector<8x32xf32>
    %232 = arith.mulf %230, %231 : vector<8x32xf32>
    %c0_87 = arith.constant 0 : index
    %c0_88 = arith.constant 0 : index
    %c0_89 = arith.constant 0 : index
    %c0_90 = arith.constant 0 : index
    %233 = vector.load %arg34[%c0_87, %c0_88, %c0_89, %c0_90] : memref<1x4x8x16xf32, #tpu.memory_space<vmem>>, vector<1x4x8x16xf32>
    %234 = vector.shape_cast %233 : vector<1x4x8x16xf32> to vector<4x8x16xf32>
    %235 = vector.shape_cast %191 : vector<4x8x16xf32> to vector<1x4x8x16xf32>
    tpu.vector_store %arg34[%c0_87, %c0_88, %c0_89, %c0_90], %235 {strides = array<i32>} : memref<1x4x8x16xf32, #tpu.memory_space<vmem>>, vector<1x4x8x16xf32>,
    %236 = arith.truncf %232 : vector<8x32xf32> to vector<8x32xbf16>
    %c0_91 = arith.constant 0 : index
    %c0_92 = arith.constant 0 : index
    %237 = vector.load %arg26[%c0_91, %c0_92] : memref<32x64xbf16, #tpu.memory_space<vmem>>, vector<32x64xbf16>
    %cst_93 = arith.constant dense<0.000000e+00> : vector<8x64xf32>
    %238 = tpu.matmul %236, %237, %cst_93 {dimension_numbers = #tpu.dot_dimension_numbers<[1], [0], [0], [1], [0, 0, 1, 1], [], []>} : vector<8x32xbf16>, vector<32x64xbf16>, vector<8x64xf32> -> vector<8x64xf32>
    %c0_94 = arith.constant 0 : index
    %c0_95 = arith.constant 0 : index
    %239 = vector.load %arg27[%c0_94, %c0_95] : memref<1x64xf32, #tpu.memory_space<vmem>>, vector<1x64xf32>
    %240 = vector.broadcast %239 : vector<1x64xf32> to vector<8x64xf32>
    %241 = arith.addf %238, %240 : vector<8x64xf32>
    %cst_96 = arith.constant 0.000000e+00 : f32
    %242 = vector.broadcast %cst_96 : f32 to vector<8x64xf32>
    %243 = arith.maximumf %241, %242 : vector<8x64xf32>
    %244 = arith.truncf %243 : vector<8x64xf32> to vector<8x64xbf16>
    %c0_97 = arith.constant 0 : index
    %c0_98 = arith.constant 0 : index
    %245 = vector.load %arg28[%c0_97, %c0_98] : memref<64x32xbf16, #tpu.memory_space<vmem>>, vector<64x32xbf16>
    %cst_99 = arith.constant dense<0.000000e+00> : vector<8x32xf32>
    %246 = tpu.matmul %244, %245, %cst_99 {dimension_numbers = #tpu.dot_dimension_numbers<[1], [0], [0], [1], [0, 0, 1, 1], [], []>} : vector<8x64xbf16>, vector<64x32xbf16>, vector<8x32xf32> -> vector<8x32xf32>
    %c0_100 = arith.constant 0 : index
    %c0_101 = arith.constant 0 : index
    %247 = vector.load %arg29[%c0_100, %c0_101] : memref<1x32xf32, #tpu.memory_space<vmem>>, vector<1x32xf32>
    %248 = vector.broadcast %247 : vector<1x32xf32> to vector<8x32xf32>
    %249 = arith.addf %246, %248 : vector<8x32xf32>
    %250 = arith.addf %249, %232 : vector<8x32xf32>
    %c0_102 = arith.constant 0 : index
    %c0_103 = arith.constant 0 : index
    %251 = vector.load %arg30[%c0_102, %c0_103] : memref<1x32xf32, #tpu.memory_space<vmem>>, vector<1x32xf32>
    %c0_104 = arith.constant 0 : index
    %c0_105 = arith.constant 0 : index
    %252 = vector.load %arg31[%c0_104, %c0_105] : memref<1x32xf32, #tpu.memory_space<vmem>>, vector<1x32xf32>
    %cst_106 = arith.constant dense<0.000000e+00> : vector<8xf32>
    %253 = vector.multi_reduction <add>, %250, %cst_106 [1] : vector<8x32xf32> to vector<8xf32>
    %254 = vector.shape_cast %253 : vector<8xf32> to vector<8x1xf32>
    %cst_107 = arith.constant 3.200000e+01 : f32
    %255 = vector.broadcast %cst_107 : f32 to vector<8x1xf32>
    %256 = arith.divf %254, %255 : vector<8x1xf32>
    %257 = vector.broadcast %256 : vector<8x1xf32> to vector<8x32xf32>
    %258 = arith.subf %250, %257 : vector<8x32xf32>
    %259 = arith.mulf %258, %258 : vector<8x32xf32>
    %cst_108 = arith.constant dense<0.000000e+00> : vector<8xf32>
    %260 = vector.multi_reduction <add>, %259, %cst_108 [1] : vector<8x32xf32> to vector<8xf32>
    %261 = vector.shape_cast %260 : vector<8xf32> to vector<8x1xf32>
    %cst_109 = arith.constant 3.200000e+01 : f32
    %262 = vector.broadcast %cst_109 : f32 to vector<8x1xf32>
    %263 = arith.divf %261, %262 : vector<8x1xf32>
    %264 = vector.broadcast %256 : vector<8x1xf32> to vector<8x32xf32>
    %265 = arith.subf %250, %264 : vector<8x32xf32>
    %cst_110 = arith.constant 9.99999974E-6 : f32
    %266 = vector.broadcast %cst_110 : f32 to vector<8x1xf32>
    %267 = arith.addf %263, %266 : vector<8x1xf32>
    %268 = math.rsqrt %267 : vector<8x1xf32>
    %269 = vector.broadcast %268 : vector<8x1xf32> to vector<8x32xf32>
    %270 = arith.mulf %265, %269 : vector<8x32xf32>
    %271 = vector.broadcast %251 : vector<1x32xf32> to vector<8x32xf32>
    %272 = arith.mulf %270, %271 : vector<8x32xf32>
    %273 = vector.broadcast %252 : vector<1x32xf32> to vector<8x32xf32>
    %274 = arith.addf %272, %273 : vector<8x32xf32>
    %275 = vector.broadcast %5 : vector<8x1xf32> to vector<8x32xf32>
    %276 = arith.mulf %274, %275 : vector<8x32xf32>
    %c0_111 = arith.constant 0 : index
    %c0_112 = arith.constant 0 : index
    %c0_113 = arith.constant 0 : index
    %277 = vector.load %arg32[%c0_111, %c0_112, %c0_113] : memref<1x8x32xf32, #tpu.memory_space<vmem>>, vector<1x8x32xf32>
    %278 = vector.shape_cast %277 : vector<1x8x32xf32> to vector<8x32xf32>
    %279 = vector.shape_cast %276 : vector<8x32xf32> to vector<1x8x32xf32>
    tpu.vector_store %arg32[%c0_111, %c0_112, %c0_113], %279 {strides = array<i32>} : memref<1x8x32xf32, #tpu.memory_space<vmem>>, vector<1x8x32xf32>,
    return
  }
  func.func @transform_0(%arg0: i32) -> (i32, i32, i32) {
    %c0_i32 = arith.constant 0 : i32
    %c0_i32_0 = arith.constant 0 : i32
    %c0_i32_1 = arith.constant 0 : i32
    return %arg0, %c0_i32, %c0_i32_0 : i32, i32, i32
  }
  func.func @transform_1(%arg0: i32) -> (i32, i32, i32) {
    %c0_i32 = arith.constant 0 : i32
    %c0_i32_0 = arith.constant 0 : i32
    %c0_i32_1 = arith.constant 0 : i32
    return %arg0, %c0_i32, %c0_i32_0 : i32, i32, i32
  }
  func.func @transform_2(%arg0: i32) -> (i32, i32, i32) {
    %c0_i32 = arith.constant 0 : i32
    %c0_i32_0 = arith.constant 0 : i32
    %c0_i32_1 = arith.constant 0 : i32
    return %arg0, %c0_i32, %c0_i32_0 : i32, i32, i32
  }
  func.func @transform_3(%arg0: i32) -> (i32, i32, i32) {
    %c0_i32 = arith.constant 0 : i32
    %c0_i32_0 = arith.constant 0 : i32
    %c0_i32_1 = arith.constant 0 : i32
    return %arg0, %c0_i32, %c0_i32_0 : i32, i32, i32
  }
  func.func @transform_4(%arg0: i32) -> (i32, i32, i32) {
    %c0_i32 = arith.constant 0 : i32
    %c0_i32_0 = arith.constant 0 : i32
    %c0_i32_1 = arith.constant 0 : i32
    return %arg0, %c0_i32, %c0_i32_0 : i32, i32, i32
  }
  func.func @transform_5(%arg0: i32) -> (i32, i32) {
    %c0_i32 = arith.constant 0 : i32
    %c0_i32_0 = arith.constant 0 : i32
    %c0_i32_1 = arith.constant 0 : i32
    return %c0_i32, %c0_i32_0 : i32, i32
  }
  func.func @transform_6(%arg0: i32) -> (i32, i32) {
    %c0_i32 = arith.constant 0 : i32
    %c0_i32_0 = arith.constant 0 : i32
    %c0_i32_1 = arith.constant 0 : i32
    return %c0_i32, %c0_i32_0 : i32, i32
  }
  func.func @transform_7(%arg0: i32) -> (i32, i32) {
    %c0_i32 = arith.constant 0 : i32
    %c0_i32_0 = arith.constant 0 : i32
    %c0_i32_1 = arith.constant 0 : i32
    return %c0_i32, %c0_i32_0 : i32, i32
  }
  func.func @transform_8(%arg0: i32) -> (i32, i32) {
    %c0_i32 = arith.constant 0 : i32
    %c0_i32_0 = arith.constant 0 : i32
    %c0_i32_1 = arith.constant 0 : i32
    return %c0_i32, %c0_i32_0 : i32, i32
  }
  func.func @transform_9(%arg0: i32) -> (i32, i32) {
    %c0_i32 = arith.constant 0 : i32
    %c0_i32_0 = arith.constant 0 : i32
    %c0_i32_1 = arith.constant 0 : i32
    return %c0_i32, %c0_i32_0 : i32, i32
  }
  func.func @transform_10(%arg0: i32) -> (i32, i32) {
    %c0_i32 = arith.constant 0 : i32
    %c0_i32_0 = arith.constant 0 : i32
    %c0_i32_1 = arith.constant 0 : i32
    return %c0_i32, %c0_i32_0 : i32, i32
  }
  func.func @transform_11(%arg0: i32) -> (i32, i32) {
    %c0_i32 = arith.constant 0 : i32
    %c0_i32_0 = arith.constant 0 : i32
    %c0_i32_1 = arith.constant 0 : i32
    return %c0_i32, %c0_i32_0 : i32, i32
  }
  func.func @transform_12(%arg0: i32) -> (i32, i32) {
    %c0_i32 = arith.constant 0 : i32
    %c0_i32_0 = arith.constant 0 : i32
    %c0_i32_1 = arith.constant 0 : i32
    return %c0_i32, %c0_i32_0 : i32, i32
  }
  func.func @transform_13(%arg0: i32) -> (i32, i32) {
    %c0_i32 = arith.constant 0 : i32
    %c0_i32_0 = arith.constant 0 : i32
    %c0_i32_1 = arith.constant 0 : i32
    return %c0_i32, %c0_i32_0 : i32, i32
  }
  func.func @transform_14(%arg0: i32) -> (i32, i32) {
    %c0_i32 = arith.constant 0 : i32
    %c0_i32_0 = arith.constant 0 : i32
    %c0_i32_1 = arith.constant 0 : i32
    return %c0_i32, %c0_i32_0 : i32, i32
  }
  func.func @transform_15(%arg0: i32) -> (i32, i32) {
    %c0_i32 = arith.constant 0 : i32
    %c0_i32_0 = arith.constant 0 : i32
    %c0_i32_1 = arith.constant 0 : i32
    return %c0_i32, %c0_i32_0 : i32, i32
  }
  func.func @transform_16(%arg0: i32) -> (i32, i32) {
    %c0_i32 = arith.constant 0 : i32
    %c0_i32_0 = arith.constant 0 : i32
    %c0_i32_1 = arith.constant 0 : i32
    return %c0_i32, %c0_i32_0 : i32, i32
  }
  func.func @transform_17(%arg0: i32) -> (i32, i32) {
    %c0_i32 = arith.constant 0 : i32
    %c0_i32_0 = arith.constant 0 : i32
    %c0_i32_1 = arith.constant 0 : i32
    return %c0_i32, %c0_i32_0 : i32, i32
  }
  func.func @transform_18(%arg0: i32) -> (i32, i32) {
    %c0_i32 = arith.constant 0 : i32
    %c0_i32_0 = arith.constant 0 : i32
    %c0_i32_1 = arith.constant 0 : i32
    return %c0_i32, %c0_i32_0 : i32, i32
  }
  func.func @transform_19(%arg0: i32) -> (i32, i32) {
    %c0_i32 = arith.constant 0 : i32
    %c0_i32_0 = arith.constant 0 : i32
    %c0_i32_1 = arith.constant 0 : i32
    return %c0_i32, %c0_i32_0 : i32, i32
  }
  func.func @transform_20(%arg0: i32) -> (i32, i32) {
    %c0_i32 = arith.constant 0 : i32
    %c0_i32_0 = arith.constant 0 : i32
    %c0_i32_1 = arith.constant 0 : i32
    return %c0_i32, %c0_i32_0 : i32, i32
  }
  func.func @transform_21(%arg0: i32) -> (i32, i32) {
    %c0_i32 = arith.constant 0 : i32
    %c0_i32_0 = arith.constant 0 : i32
    %c0_i32_1 = arith.constant 0 : i32
    return %c0_i32, %c0_i32_0 : i32, i32
  }
  func.func @transform_22(%arg0: i32) -> (i32, i32) {
    %c0_i32 = arith.constant 0 : i32
    %c0_i32_0 = arith.constant 0 : i32
    %c0_i32_1 = arith.constant 0 : i32
    return %c0_i32, %c0_i32_0 : i32, i32
  }
  func.func @transform_23(%arg0: i32) -> (i32, i32) {
    %c0_i32 = arith.constant 0 : i32
    %c0_i32_0 = arith.constant 0 : i32
    %c0_i32_1 = arith.constant 0 : i32
    return %c0_i32, %c0_i32_0 : i32, i32
  }
  func.func @transform_24(%arg0: i32) -> (i32, i32) {
    %c0_i32 = arith.constant 0 : i32
    %c0_i32_0 = arith.constant 0 : i32
    %c0_i32_1 = arith.constant 0 : i32
    return %c0_i32, %c0_i32_0 : i32, i32
  }
  func.func @transform_25(%arg0: i32) -> (i32, i32) {
    %c0_i32 = arith.constant 0 : i32
    %c0_i32_0 = arith.constant 0 : i32
    %c0_i32_1 = arith.constant 0 : i32
    return %c0_i32, %c0_i32_0 : i32, i32
  }
  func.func @transform_26(%arg0: i32) -> (i32, i32) {
    %c0_i32 = arith.constant 0 : i32
    %c0_i32_0 = arith.constant 0 : i32
    %c0_i32_1 = arith.constant 0 : i32
    return %c0_i32, %c0_i32_0 : i32, i32
  }
  func.func @transform_27(%arg0: i32) -> (i32, i32) {
    %c0_i32 = arith.constant 0 : i32
    %c0_i32_0 = arith.constant 0 : i32
    %c0_i32_1 = arith.constant 0 : i32
    return %c0_i32, %c0_i32_0 : i32, i32
  }
  func.func @transform_28(%arg0: i32) -> (i32, i32) {
    %c0_i32 = arith.constant 0 : i32
    %c0_i32_0 = arith.constant 0 : i32
    %c0_i32_1 = arith.constant 0 : i32
    return %c0_i32, %c0_i32_0 : i32, i32
  }
  func.func @transform_29(%arg0: i32) -> (i32, i32) {
    %c0_i32 = arith.constant 0 : i32
    %c0_i32_0 = arith.constant 0 : i32
    %c0_i32_1 = arith.constant 0 : i32
    return %c0_i32, %c0_i32_0 : i32, i32
  }
  func.func @transform_30(%arg0: i32) -> (i32, i32) {
    %c0_i32 = arith.constant 0 : i32
    %c0_i32_0 = arith.constant 0 : i32
    %c0_i32_1 = arith.constant 0 : i32
    return %c0_i32, %c0_i32_0 : i32, i32
  }
  func.func @transform_31(%arg0: i32) -> (i32, i32, i32) {
    %c0_i32 = arith.constant 0 : i32
    %c0_i32_0 = arith.constant 0 : i32
    %c0_i32_1 = arith.constant 0 : i32
    return %arg0, %c0_i32, %c0_i32_0 : i32, i32, i32
  }
  func.func @transform_32(%arg0: i32) -> (i32, i32, i32, i32) {
    %c0_i32 = arith.constant 0 : i32
    %c0_i32_0 = arith.constant 0 : i32
    %c0_i32_1 = arith.constant 0 : i32
    %c0_i32_2 = arith.constant 0 : i32
    return %arg0, %c0_i32, %c0_i32_0, %c0_i32_1 : i32, i32, i32, i32
  }
  func.func @transform_33(%arg0: i32) -> (i32, i32, i32, i32) {
    %c0_i32 = arith.constant 0 : i32
    %c0_i32_0 = arith.constant 0 : i32
    %c0_i32_1 = arith.constant 0 : i32
    %c0_i32_2 = arith.constant 0 : i32
    return %arg0, %c0_i32, %c0_i32_0, %c0_i32_1 : i32, i32, i32, i32
  }
}

</mosaic_0001>

<bundles_post_ra>
// kernel: decoder_layer.1
= control target key start
LH: loop header
LB: loop body
LE: loop exit
PB: predicated region body
PF: predicated region fallthrough
CT: control target
= control target key end

     0   :  { %s4698_s6 = smov 1   ;;  %s4699_s10 = smov 2   ;;  %s5590_s0 = inlined_call_operand.smem [shape: u32[34], index: -1, kind: input, shape index: {}] }
   0x1   :  { %s4767_s5 = sld [smem:[%s5590_s0]]   ;;  %s4700_s14 = smov 3  }
   0x2   :  { %s4772_s9 = sld [smem:[%s5590_s0 + %s4698_s6]]   ;;  %s4701_s18 = smov 4  }
   0x3   :  { %s4777_s13 = sld [smem:[%s5590_s0 + %s4699_s10]]   ;;  %s4702_s22 = smov 5  }
   0x4   :  { %s4782_s17 = sld [smem:[%s5590_s0 + %s4700_s14]]   ;;  %s4703_s26 = smov 6  }
   0x5   :  { %s4787_s21 = sld [smem:[%s5590_s0 + %s4701_s18]]   ;;  %s4704_s30 = smov 7  }
   0x6   :  { %s4792_s25 = sld [smem:[%s5590_s0 + %s4702_s22]]   ;;  %s4705_s4 = smov 8  }
   0x7   :  { %5624 = sst [smem:[#allocation39_spill]] %s4767_s5  ;;  %s4706_s10 = smov 9  }
   0x8   :  { %5625 = sst [smem:[#allocation40_spill]] %s4772_s9  ;;  %s4707_s15 = smov 10  }
   0x9   :  { %5626 = sst [smem:[#allocation41_spill]] %s4777_s13  ;;  %s4708_s20 = smov 11  }
   0xa   :  { %5627 = sst [smem:[#allocation42_spill]] %s4782_s17  ;;  %s4710_s1 = smov 13  }
   0xb   :  { %5628 = sst [smem:[#allocation43_spill]] %s4787_s21  ;;  %s4711_s7 = smov 14  }
   0xc   :  { %5629 = sst [smem:[#allocation44_spill]] %s4792_s25  ;;  %s4713_s22 = smov 16  }
   0xd   :  { %s4797_s29 = sld [smem:[%s5590_s0 + %s4703_s26]]   ;;  %s4709_s26 = smov 12  }
   0xe   :  { %s4802_s3 = sld [smem:[%s5590_s0 + %s4704_s30]]   ;;  %s4714_s28 = smov 17  }
   0xf   :  { %s4807_s8 = sld [smem:[%s5590_s0 + %s4705_s4]]  }
  0x10   :  { %s4812_s14 = sld [smem:[%s5590_s0 + %s4706_s10]]  }
  0x11   :  { %s4817_s19 = sld [smem:[%s5590_s0 + %s4707_s15]]   ;;  %s4712_s15 = smov 15  }
  0x12   :  { %s4822_s24 = sld [smem:[%s5590_s0 + %s4708_s20]]  }
  0x13   :  { %5630 = sst [smem:[#allocation45_spill]] %s4797_s29 }
  0x14   :  { %5631 = sst [smem:[#allocation46_spill]] %s4802_s3 }
  0x15   :  { %5632 = sst [smem:[#allocation47_spill]] %s4807_s8 }
  0x16   :  { %5633 = sst [smem:[#allocation48_spill]] %s4812_s14 }
  0x17   :  { %5634 = sst [smem:[#allocation49_spill]] %s4817_s19 }
  0x18   :  { %5635 = sst [smem:[#allocation50_spill]] %s4822_s24 }
  0x19   :  { %s4827_s30 = sld [smem:[%s5590_s0 + %s4709_s26]]  }
  0x1a   :  { %s4832_s6 = sld [smem:[%s5590_s0 + %s4710_s1]]  }
  0x1b   :  { %s4837_s12 = sld [smem:[%s5590_s0 + %s4711_s7]]   ;;  %s4715_s7 = smov 18  }
  0x1c   :  { %s4842_s20 = sld [smem:[%s5590_s0 + %s4712_s15]]   ;;  %s4716_s15 = smov 19  }
  0x1d   :  { %s4847_s27 = sld [smem:[%s5590_s0 + %s4713_s22]]   ;;  %s4717_s22 = smov 20  }
  0x1e   :  { %s4852_s4 = sld [smem:[%s5590_s0 + %s4714_s28]]   ;;  %s4718_s28 = smov 21  }
  0x1f   :  { %5636 = sst [smem:[#allocation51_spill]] %s4827_s30 }
  0x20   :  { %5637 = sst [smem:[#allocation52_spill]] %s4832_s6 }
  0x21   :  { %5638 = sst [smem:[#allocation53_spill]] %s4837_s12 }
  0x22   :  { %5639 = sst [smem:[#allocation54_spill]] %s4842_s20 }
  0x23   :  { %s4857_s12 = sld [smem:[%s5590_s0 + %s4715_s7]]   ;;  %s4719_s7 = smov 22  }
  0x24   :  { %5640 = sst [smem:[#allocation55_spill]] %s4852_s4 }
  0x25   :  { %s4862_s6 = sld [smem:[%s5590_s0 + %s4716_s15]]   ;;  %s4720_s15 = smov 23  }
  0x26   :  { %s4867_s9 = sld [smem:[%s5590_s0 + %s4717_s22]]   ;;  %s4721_s22 = smov 24  }
  0x27   :  { %s4872_s21 = sld [smem:[%s5590_s0 + %s4718_s28]]   ;;  %s4722_s28 = smov 25  }
  0x28   :  { %s4877_s30 = sld [smem:[%s5590_s0 + %s4719_s7]]   ;;  %s4723_s7 = smov 26  }
  0x29   :  { %s4882_s24 = sld [smem:[%s5590_s0 + %s4720_s15]]   ;;  %s4724_s15 = smov 27  }
  0x2a   :  { %s4887_s13 = sld [smem:[%s5590_s0 + %s4721_s22]]   ;;  %s4725_s22 = smov 28  }
  0x2b   :  { %5641 = sst [smem:[#allocation56_spill]] %s4862_s6 }
  0x2c   :  { %5642 = sst [smem:[#allocation57_spill]] %s4867_s9 }
  0x2d   :  { %s4892_s19 = sld [smem:[%s5590_s0 + %s4722_s28]]   ;;  %s4726_s28 = smov 29  }
  0x2e   :  { %s4897_s8 = sld [smem:[%s5590_s0 + %s4723_s7]]   ;;  %s4727_s7 = smov 30  }
  0x2f   :  { %s4902_s29 = sld [smem:[%s5590_s0 + %s4724_s15]]   ;;  %s4728_s15 = smov 31  }
  0x30   :  { %s4907_s14 = sld [smem:[%s5590_s0 + %s4725_s22]]   ;;  %s4729_s22 = smov 32  }
  0x31   :  { %s4912_s5 = sld [smem:[%s5590_s0 + %s4726_s28]]   ;;  %s4730_s28 = smov 33  }
  0x32   :  { %s4917_s3 = sld [smem:[%s5590_s0 + %s4727_s7]]  }
  0x33   :  { %s4927_s25 = sld [smem:[%s5590_s0 + %s4729_s22]]  }
  0x34   :  { %5643 = sst [smem:[#allocation58_spill]] %s4897_s8 }
  0x35   :  { %5644 = sst [smem:[#allocation59_spill]] %s4902_s29 }
  0x36   :  { %s4922_s29 = sld [smem:[%s5590_s0 + %s4728_s15]]  }
  0x37   :  { %5645 = sst [smem:[#allocation60_spill]] %s4912_s5 }
  0x38   :  { %5646 = sst [smem:[#allocation61_spill]] %s4917_s3 }
  0x39   :  { %s4932_s17 = sld [smem:[%s5590_s0 + %s4730_s28]]  }
  0x3c   :  { %5647 = sst [smem:[#allocation62_spill]] %s4922_s29 }
  0x3f   :  { %5648 = sst [smem:[#allocation63_spill]] %s4932_s17 }
  0x40   :  { %73 = vsyncpa [#allocation3], 0 }
  0x41   :  { %75 = vsyncpa [#allocation3 + $0x1], 0 }
  0x42   :  { %76 = vsyncpa [#allocation6], 0 }
  0x43   :  { %77 = vsyncpa [#allocation9], 0 }
  0x44   :  { %78 = vsyncpa [#allocation12], 0 }
  0x45   :  { %79 = vsyncpa [#allocation15], 0 }
  0x46   :  { %80 = vsyncpa [#allocation18], 0 }
  0x47   :  { %81 = vsyncpa [#allocation21], 0 }
  0x48   :  { %82 = vsyncpa [#allocation24], 0 }
  0x49   :  { %83 = vsyncpa [#allocation27], 0 }
  0x4a   :  { %84 = vsyncpa [#allocation4], 0 }
  0x4b   :  { %86 = vsyncpa [#allocation4 + $0x1], 0  ;;  %s4934_s7 = smov 0   ;;  %s4936_s10 = smov 0  }
  0x4c   :  { %s4938_s11 = smov 0   ;;  %s4940_s0 = smov 0  }
  0x4d LB: > { %s5649_s9 = sld [smem:[#allocation57_spill]]  ;;  %s5650_s8 = sld [smem:[#allocation58_spill]]  ;;  %s4692_s11 = sphi %s4938_s11, %s5713_s11   ;;  %s4688_s10 = sphi %s4936_s10, %s5712_s10   ;;  %s4684_s7 = sphi %s4934_s7, %s5711_s7   ;;  %s4696_s0 = sphi %s4940_s0, %s5714_s0  }
  0x4e   : > { %s5651_s6 = sld [smem:[#allocation56_spill]]  ;;  %s5652_s5 = sld [smem:[#allocation60_spill]] }
  0x4f   : > { %s5653_s3 = sld [smem:[#allocation61_spill]]  ;;  %s5654_s20 = sld [smem:[#allocation54_spill]] }
  0x50   : > { %s5655_s4 = sld [smem:[#allocation55_spill]]  ;;  %s4731_s15 = smov [#allocation5]  }
  0x51   : > { %s893_s16 = sshll.u32 %s4731_s15, 4  ;;  %s4955_s18 = sadd.s32 4294967295, %s4696_s0   ;;  %s4960_s16 = int_to_ptr.vmem [resolvable:$true] %s893_s16 }
  0x52   : > { %p3455_p0 = scmp.ge.s32.totalorder %s4696_s0, 1  ;;  %p5598_p1 = scmp.eq.s32.totalorder %s4955_s18, 0 }
  0x53   : > { %p851_p2 = scmp.lt.s32.totalorder %s4696_s0, 3  ;;  %s4732_s23 = smov [#allocation8]  }
  0x54   : > { %s917_s26 = sshll.u32 %s4732_s23, 4  ;;  %s4733_s1 = smov [#allocation11]   ;;  %s4975_s26 = int_to_ptr.vmem [resolvable:$true] %s917_s26 }
  0x55   : > { %p4962_p3 = pnand %p3455_p0, %p851_p2  ;;  %s941_s2 = sshll.u32 %s4733_s1, 4  ;;  %s4977_s2 = int_to_ptr.vmem [resolvable:$true] %s941_s2 }
  0x56   : > { %s4148_s15 = scalar_lea.hbm %s5654_s20, 256 }
  0x57   : > { %s5656_s22 = scalar_select %p4962_p3, 1, 0 }
  0x58   : > { %p3880_p5 = pneg %p4962_p3  ;;  %p4149_p7 = scmp.ne.s32.totalorder %s5654_s20, %s4148_s15 }
  0x59   : > { %p4155_p11 = scmp.lt.u32.totalorder %s4148_s15, %s5654_s20 }
  0x5a   : > { %p4971_p6 = pnand %p3880_p5, %p5598_p1 }
  0x5c   : > { %p4983_p8 = pneg %p4971_p6 }
  0x5e   : > { %p4151_p9 = pnand %p4983_p8, %p4149_p7 }
  0x60   : > { %p4152_p10 = pneg %p4151_p9 }
  0x62   : > { %p4157_p12 = pnand %p4155_p11, %p4152_p10 }
  0x64   : > { %4160 = shalt.err (!%p4157_p12)
}
  0x65   : > { %s4161_s23 = scalar_lea.vmem %s4960_s16, 256  ;;  %p4169_p5 = scmp.lt.s32.totalorder %s4960_s16, %s4960_s16 }
  0x66   : > { %p4162_p13 = scmp.ne.s32.totalorder %s4960_s16, %s4161_s23  ;;  %p4170_p4 = scmp.lt.s32.totalorder %s4161_s23, %s4161_s23 }
  0x68   : > { %p4164_p0 = pnand %p4162_p13, %p4983_p8  ;;  %p4171_p1 = por %p4170_p4, %p4169_p5 }
  0x6a   : > { %p4165_p2 = pneg %p4164_p0 }
  0x6c   : > { %p4172_p3 = pnand %p4171_p1, %p4165_p2 }
  0x6e   : > { %4175 = shalt.err (!%p4172_p3)
}
  0x6f   : > { %s5602_s1 = smov 64   ;;  %s4735_s15 = smov 4  }
  0x70   : > { %3883 = dma.hbm_to_vmem [thread:$0]  (!%p4971_p6), %s5654_s20, 256, %s4960_s16, [#allocation6], %s5602_s1, %s5602_s1, %s4735_s15  }
  0x71   : > { %s4176_s17 = scalar_lea.hbm %s5655_s4, 256 }
  0x72   : > { %p4177_p7 = scmp.ne.s32.totalorder %s5655_s4, %s4176_s17  ;;  %p4183_p3 = scmp.lt.u32.totalorder %s4176_s17, %s5655_s4 }
  0x74   : > { %p4179_p4 = pnand %p4177_p7, %p4983_p8 }
  0x76   : > { %p4180_p1 = pneg %p4179_p4 }
  0x78   : > { %p4185_p9 = pnand %p4183_p3, %p4180_p1 }
  0x7a   : > { %4188 = shalt.err (!%p4185_p9)
}
  0x7b   : > { %s4189_s23 = scalar_lea.vmem %s4975_s26, 256  ;;  %p4197_p13 = scmp.lt.s32.totalorder %s4975_s26, %s4975_s26 }
  0x7c   : > { %p4190_p10 = scmp.ne.s32.totalorder %s4975_s26, %s4189_s23  ;;  %p4198_p0 = scmp.lt.s32.totalorder %s4189_s23, %s4189_s23 }
  0x7e   : > { %p4192_p11 = pnand %p4190_p10, %p4983_p8  ;;  %p4199_p2 = por %p4198_p0, %p4197_p13 }
  0x80   : > { %p4193_p12 = pneg %p4192_p11 }
  0x82   : > { %p4200_p5 = pnand %p4199_p2, %p4193_p12 }
  0x84   : > { %4203 = shalt.err (!%p4200_p5)
}
  0x85   : > { %3889 = dma.hbm_to_vmem [thread:$0]  (!%p4971_p6), %s5655_s4, 256, %s4975_s26, [#allocation9], %s5602_s1, %s5602_s1, %s4735_s15  }
  0x86   : > { %s4204_s17 = scalar_lea.hbm %s5651_s6, 256 }
  0x87   : > { %p4205_p7 = scmp.ne.s32.totalorder %s5651_s6, %s4204_s17  ;;  %p4211_p3 = scmp.lt.u32.totalorder %s4204_s17, %s5651_s6 }
  0x89   : > { %p4207_p4 = pnand %p4205_p7, %p4983_p8 }
  0x8b   : > { %p4208_p1 = pneg %p4207_p4 }
  0x8d   : > { %p4213_p9 = pnand %p4211_p3, %p4208_p1 }
  0x8f   : > { %4216 = shalt.err (!%p4213_p9)
}
  0x90   : > { %s4217_s16 = scalar_lea.vmem %s4977_s2, 256  ;;  %p4225_p13 = scmp.lt.s32.totalorder %s4977_s2, %s4977_s2 }
  0x91   : > { %p4218_p10 = scmp.ne.s32.totalorder %s4977_s2, %s4217_s16  ;;  %p4226_p0 = scmp.lt.s32.totalorder %s4217_s16, %s4217_s16 }
  0x93   : > { %p4220_p11 = pnand %p4218_p10, %p4983_p8  ;;  %p4227_p2 = por %p4226_p0, %p4225_p13 }
  0x95   : > { %p4221_p12 = pneg %p4220_p11 }
  0x97   : > { %p4228_p5 = pnand %p4227_p2, %p4221_p12 }
  0x99   : > { %4231 = shalt.err (!%p4228_p5)
}
  0x9a   : > { %3895 = dma.hbm_to_vmem [thread:$0]  (!%p4971_p6), %s5651_s6, 256, %s4977_s2, [#allocation12], %s5602_s1, %s5602_s1, %s4735_s15  }
  0x9b   : > { %s4736_s26 = smov [#allocation14]   ;;  %s4737_s17 = smov [#allocation17]  }
  0x9c   : > { %s965_s23 = sshll.u32 %s4736_s26, 4  ;;  %s990_s16 = sshll.u32 %s4737_s17, 4  ;;  %s966_s23 = int_to_ptr.vmem [resolvable:$true] %s965_s23  ;;  %s991_s16 = int_to_ptr.vmem [resolvable:$true] %s990_s16 }
  0x9d   : > { %s4232_s4 = scalar_lea.hbm %s4872_s21, 256 }
  0x9e   : > { %p4233_p7 = scmp.ne.s32.totalorder %s4872_s21, %s4232_s4  ;;  %p4239_p3 = scmp.lt.u32.totalorder %s4232_s4, %s4872_s21 }
  0xa0   : > { %p4235_p4 = pnand %p4233_p7, %p4983_p8 }
  0xa2   : > { %p4236_p1 = pneg %p4235_p4 }
  0xa4   : > { %p4241_p9 = pnand %p4239_p3, %p4236_p1 }
  0xa6   : > { %4244 = shalt.err (!%p4241_p9)
}
  0xa7   : > { %s4245_s20 = scalar_lea.vmem %s966_s23, 256  ;;  %p4253_p13 = scmp.lt.s32.totalorder %s966_s23, %s966_s23 }
  0xa8   : > { %p4246_p10 = scmp.ne.s32.totalorder %s966_s23, %s4245_s20  ;;  %p4254_p0 = scmp.lt.s32.totalorder %s4245_s20, %s4245_s20 }
  0xaa   : > { %p4248_p11 = pnand %p4246_p10, %p4983_p8  ;;  %p4255_p2 = por %p4254_p0, %p4253_p13 }
  0xac   : > { %p4249_p12 = pneg %p4248_p11 }
  0xae   : > { %p4256_p5 = pnand %p4255_p2, %p4249_p12 }
  0xb0   : > { %4259 = shalt.err (!%p4256_p5)
}
  0xb1   : > { %3901 = dma.hbm_to_vmem [thread:$0]  (!%p4971_p6), %s4872_s21, 256, %s966_s23, [#allocation15], %s5602_s1, %s5602_s1, %s4735_s15  }
  0xb2   : > { %s4260_s4 = scalar_lea.hbm %s4882_s24, 16 }
  0xb3   : > { %p4261_p7 = scmp.ne.s32.totalorder %s4882_s24, %s4260_s4  ;;  %p4267_p3 = scmp.lt.u32.totalorder %s4260_s4, %s4882_s24 }
  0xb5   : > { %p4263_p4 = pnand %p4261_p7, %p4983_p8 }
  0xb7   : > { %p4264_p1 = pneg %p4263_p4 }
  0xb9   : > { %p4269_p9 = pnand %p4267_p3, %p4264_p1 }
  0xbb   : > { %4272 = shalt.err (!%p4269_p9)
}
  0xbc   : > { %s4273_s20 = scalar_lea.vmem %s991_s16, 16  ;;  %s4280_s2 = scalar_lea.vmem %s991_s16, 32 }
  0xbd   : > { %p4274_p10 = scmp.ne.s32.totalorder %s991_s16, %s4273_s20  ;;  %p4281_p13 = scmp.lt.s32.totalorder %s991_s16, %s991_s16 }
  0xbe   : > { %p4282_p0 = scmp.lt.s32.totalorder %s4280_s2, %s4273_s20 }
  0xbf   : > { %p4276_p11 = pnand %p4274_p10, %p4983_p8 }
  0xc0   : > { %p4283_p2 = por %p4282_p0, %p4281_p13 }
  0xc1   : > { %p4277_p12 = pneg %p4276_p11 }
  0xc3   : > { %p4284_p5 = pnand %p4283_p2, %p4277_p12 }
  0xc5   : > { %4287 = shalt.err (!%p4284_p5)
}
  0xc6   : > { %3907 = dma.hbm_to_vmem [thread:$0]  (!%p4971_p6), %s4882_s24, 16, %s991_s16, [#allocation18]  }
  0xc7   : > { %s4738_s26 = smov [#allocation20]   ;;  %s4739_s17 = smov [#allocation23]  }
  0xc8   : > { %s1011_s23 = sshll.u32 %s4738_s26, 4  ;;  %s1039_s4 = sshll.u32 %s4739_s17, 4  ;;  %s1012_s23 = int_to_ptr.vmem [resolvable:$true] %s1011_s23  ;;  %s1040_s4 = int_to_ptr.vmem [resolvable:$true] %s1039_s4 }
  0xc9   : > { %s4288_s1 = scalar_lea.hbm %s4892_s19, 256 }
  0xca   : > { %p4289_p7 = scmp.ne.s32.totalorder %s4892_s19, %s4288_s1  ;;  %p4295_p3 = scmp.lt.u32.totalorder %s4288_s1, %s4892_s19 }
  0xcc   : > { %p4291_p4 = pnand %p4289_p7, %p4983_p8 }
  0xce   : > { %p4292_p1 = pneg %p4291_p4 }
  0xd0   : > { %p4297_p9 = pnand %p4295_p3, %p4292_p1 }
  0xd2   : > { %4300 = shalt.err (!%p4297_p9)
}
  0xd3   : > { %s4301_s20 = scalar_lea.vmem %s1012_s23, 256  ;;  %p4309_p13 = scmp.lt.s32.totalorder %s1012_s23, %s1012_s23 }
  0xd4   : > { %p4302_p10 = scmp.ne.s32.totalorder %s1012_s23, %s4301_s20  ;;  %p4310_p0 = scmp.lt.s32.totalorder %s4301_s20, %s4301_s20 }
  0xd6   : > { %p4304_p11 = pnand %p4302_p10, %p4983_p8  ;;  %p4311_p2 = por %p4310_p0, %p4309_p13 }
  0xd8   : > { %p4305_p12 = pneg %p4304_p11 }
  0xda   : > { %p4312_p5 = pnand %p4311_p2, %p4305_p12 }
  0xdc   : > { %4315 = shalt.err (!%p4312_p5)
}
  0xdd   : > { %s5659_s16 = smov 64   ;;  %s4316_s1 = scalar_lea.hbm %s4907_s14, 16 }
  0xde   : > { %3913 = dma.hbm_to_vmem [thread:$0]  (!%p4971_p6), %s4892_s19, 256, %s1012_s23, [#allocation21], %s5659_s16, %s5659_s16, %s4735_s15  }
  0xdf   : > { %p4317_p7 = scmp.ne.s32.totalorder %s4907_s14, %s4316_s1  ;;  %p4323_p3 = scmp.lt.u32.totalorder %s4316_s1, %s4907_s14 }
  0xe1   : > { %p4319_p4 = pnand %p4317_p7, %p4983_p8 }
  0xe3   : > { %p4320_p1 = pneg %p4319_p4 }
  0xe5   : > { %p4325_p9 = pnand %p4323_p3, %p4320_p1 }
  0xe7   : > { %4328 = shalt.err (!%p4325_p9)
}
  0xe8   : > { %s4329_s2 = scalar_lea.vmem %s1040_s4, 16  ;;  %s4336_s26 = scalar_lea.vmem %s1040_s4, 32 }
  0xe9   : > { %p4330_p10 = scmp.ne.s32.totalorder %s1040_s4, %s4329_s2  ;;  %p4337_p13 = scmp.lt.s32.totalorder %s1040_s4, %s1040_s4 }
  0xea   : > { %p4338_p0 = scmp.lt.s32.totalorder %s4336_s26, %s4329_s2 }
  0xeb   : > { %p4332_p11 = pnand %p4330_p10, %p4983_p8 }
  0xec   : > { %p4339_p2 = por %p4338_p0, %p4337_p13 }
  0xed   : > { %p4333_p12 = pneg %p4332_p11 }
  0xef   : > { %p4340_p5 = pnand %p4339_p2, %p4333_p12 }
  0xf1   : > { %4343 = shalt.err (!%p4340_p5)
}
  0xf2   : > { %3919 = dma.hbm_to_vmem [thread:$0]  (!%p4971_p6), %s4907_s14, 16, %s1040_s4, [#allocation24]  }
  0xf3   : > { %s4740_s15 = smov [#allocation7]   ;;  %s4741_s17 = smov [#allocation10]  }
  0xf4   : > { %s907_s23 = sshll.u32 %s4740_s15, 4  ;;  %s931_s20 = sshll.u32 %s4741_s17, 4  ;;  %s908_s23 = int_to_ptr.vmem [resolvable:$true] %s907_s23  ;;  %s932_s20 = int_to_ptr.vmem [resolvable:$true] %s931_s20 }
  0xf5   : > { %s4344_s16 = scalar_lea.hbm %s4847_s27, 16 }
  0xf6   : > { %p4345_p7 = scmp.ne.s32.totalorder %s4847_s27, %s4344_s16  ;;  %p4351_p3 = scmp.lt.u32.totalorder %s4344_s16, %s4847_s27 }
  0xf8   : > { %p4347_p4 = pnand %p4345_p7, %p4983_p8 }
  0xfa   : > { %p4348_p1 = pneg %p4347_p4 }
  0xfc   : > { %p4353_p9 = pnand %p4351_p3, %p4348_p1 }
  0xfe   : > { %4356 = shalt.err (!%p4353_p9)
}
  0xff   : > { %s4357_s1 = scalar_lea.vmem %s908_s23, 16  ;;  %s4364_s4 = scalar_lea.vmem %s908_s23, 32 }
 0x100   : > { %p4358_p10 = scmp.ne.s32.totalorder %s908_s23, %s4357_s1  ;;  %p4365_p13 = scmp.lt.s32.totalorder %s908_s23, %s908_s23 }
 0x101   : > { %p4366_p0 = scmp.lt.s32.totalorder %s4364_s4, %s4357_s1 }
 0x102   : > { %p4360_p11 = pnand %p4358_p10, %p4983_p8 }
 0x103   : > { %p4367_p2 = por %p4366_p0, %p4365_p13 }
 0x104   : > { %p4361_p12 = pneg %p4360_p11 }
 0x106   : > { %p4368_p5 = pnand %p4367_p2, %p4361_p12 }
 0x108   : > { %4371 = shalt.err (!%p4368_p5)
}
 0x109   : > { %3886 = dma.hbm_to_vmem [thread:$0]  (!%p4971_p6), %s4847_s27, 16, %s908_s23, [#allocation6]  }
 0x10a   : > { %s4372_s2 = scalar_lea.hbm %s4857_s12, 16 }
 0x10b   : > { %p4373_p7 = scmp.ne.s32.totalorder %s4857_s12, %s4372_s2  ;;  %p4379_p3 = scmp.lt.u32.totalorder %s4372_s2, %s4857_s12 }
 0x10d   : > { %p4375_p4 = pnand %p4373_p7, %p4983_p8 }
 0x10f   : > { %p4376_p1 = pneg %p4375_p4 }
 0x111   : > { %p4381_p9 = pnand %p4379_p3, %p4376_p1 }
 0x113   : > { %4384 = shalt.err (!%p4381_p9)
}
 0x114   : > { %s4385_s26 = scalar_lea.vmem %s932_s20, 16  ;;  %s4392_s15 = scalar_lea.vmem %s932_s20, 32 }
 0x115   : > { %p4386_p10 = scmp.ne.s32.totalorder %s932_s20, %s4385_s26  ;;  %p4393_p13 = scmp.lt.s32.totalorder %s932_s20, %s932_s20 }
 0x116   : > { %p4394_p0 = scmp.lt.s32.totalorder %s4392_s15, %s4385_s26 }
 0x117   : > { %p4388_p11 = pnand %p4386_p10, %p4983_p8 }
 0x118   : > { %p4395_p2 = por %p4394_p0, %p4393_p13 }
 0x119   : > { %p4389_p12 = pneg %p4388_p11 }
 0x11b   : > { %p4396_p5 = pnand %p4395_p2, %p4389_p12 }
 0x11d   : > { %4399 = shalt.err (!%p4396_p5)
}
 0x11e   : > { %3892 = dma.hbm_to_vmem [thread:$0]  (!%p4971_p6), %s4857_s12, 16, %s932_s20, [#allocation9]  }
 0x11f   : > { %s4742_s23 = smov [#allocation13]   ;;  %s4743_s16 = smov [#allocation16]  }
 0x120   : > { %s955_s17 = sshll.u32 %s4742_s23, 4  ;;  %s979_s1 = sshll.u32 %s4743_s16, 4  ;;  %s956_s17 = int_to_ptr.vmem [resolvable:$true] %s955_s17  ;;  %s980_s1 = int_to_ptr.vmem [resolvable:$true] %s979_s1 }
 0x121   : > { %s4400_s4 = scalar_lea.hbm %s5649_s9, 16 }
 0x122   : > { %p4401_p7 = scmp.ne.s32.totalorder %s5649_s9, %s4400_s4  ;;  %p4407_p3 = scmp.lt.u32.totalorder %s4400_s4, %s5649_s9 }
 0x124   : > { %p4403_p4 = pnand %p4401_p7, %p4983_p8 }
 0x126   : > { %p4404_p1 = pneg %p4403_p4 }
 0x128   : > { %p4409_p9 = pnand %p4407_p3, %p4404_p1 }
 0x12a   : > { %4412 = shalt.err (!%p4409_p9)
}
 0x12b   : > { %s4413_s2 = scalar_lea.vmem %s956_s17, 16  ;;  %s4420_s20 = scalar_lea.vmem %s956_s17, 32 }
 0x12c   : > { %p4414_p10 = scmp.ne.s32.totalorder %s956_s17, %s4413_s2  ;;  %p4421_p13 = scmp.lt.s32.totalorder %s956_s17, %s956_s17 }
 0x12d   : > { %p4422_p0 = scmp.lt.s32.totalorder %s4420_s20, %s4413_s2 }
 0x12e   : > { %p4416_p11 = pnand %p4414_p10, %p4983_p8 }
 0x12f   : > { %p4423_p2 = por %p4422_p0, %p4421_p13 }
 0x130   : > { %p4417_p12 = pneg %p4416_p11 }
 0x132   : > { %p4424_p5 = pnand %p4423_p2, %p4417_p12 }
 0x134   : > { %4427 = shalt.err (!%p4424_p5)
}
 0x135   : > { %3898 = dma.hbm_to_vmem [thread:$0]  (!%p4971_p6), %s5649_s9, 16, %s956_s17, [#allocation12]  }
 0x136   : > { %s4428_s26 = scalar_lea.hbm %s4877_s30, 16 }
 0x137   : > { %p4429_p7 = scmp.ne.s32.totalorder %s4877_s30, %s4428_s26  ;;  %p4435_p3 = scmp.lt.u32.totalorder %s4428_s26, %s4877_s30 }
 0x139   : > { %p4431_p4 = pnand %p4429_p7, %p4983_p8 }
 0x13b   : > { %p4432_p1 = pneg %p4431_p4 }
 0x13d   : > { %p4437_p9 = pnand %p4435_p3, %p4432_p1 }
 0x13f   : > { %4440 = shalt.err (!%p4437_p9)
}
 0x140   : > { %s4441_s15 = scalar_lea.vmem %s980_s1, 16  ;;  %s4448_s23 = scalar_lea.vmem %s980_s1, 32 }
 0x141   : > { %p4442_p10 = scmp.ne.s32.totalorder %s980_s1, %s4441_s15  ;;  %p4449_p13 = scmp.lt.s32.totalorder %s980_s1, %s980_s1 }
 0x142   : > { %p4450_p0 = scmp.lt.s32.totalorder %s4448_s23, %s4441_s15 }
 0x143   : > { %p4444_p11 = pnand %p4442_p10, %p4983_p8 }
 0x144   : > { %p4451_p2 = por %p4450_p0, %p4449_p13 }
 0x145   : > { %p4445_p12 = pneg %p4444_p11 }
 0x147   : > { %p4452_p5 = pnand %p4451_p2, %p4445_p12 }
 0x149   : > { %4455 = shalt.err (!%p4452_p5)
}
 0x14a   : > { %3904 = dma.hbm_to_vmem [thread:$0]  (!%p4971_p6), %s4877_s30, 16, %s980_s1, [#allocation15]  }
 0x14b   : > { %s4744_s17 = smov [#allocation19]   ;;  %s4745_s4 = smov [#allocation22]  }
 0x14c   : > { %s1001_s16 = sshll.u32 %s4744_s17, 4  ;;  %s1025_s2 = sshll.u32 %s4745_s4, 4  ;;  %s1002_s16 = int_to_ptr.vmem [resolvable:$true] %s1001_s16  ;;  %s1026_s2 = int_to_ptr.vmem [resolvable:$true] %s1025_s2 }
 0x14d   : > { %s4456_s20 = scalar_lea.hbm %s4887_s13, 16 }
 0x14e   : > { %p4457_p7 = scmp.ne.s32.totalorder %s4887_s13, %s4456_s20  ;;  %p4463_p3 = scmp.lt.u32.totalorder %s4456_s20, %s4887_s13 }
 0x150   : > { %p4459_p4 = pnand %p4457_p7, %p4983_p8 }
 0x152   : > { %p4460_p1 = pneg %p4459_p4 }
 0x154   : > { %p4465_p9 = pnand %p4463_p3, %p4460_p1 }
 0x156   : > { %4468 = shalt.err (!%p4465_p9)
}
 0x157   : > { %s4469_s26 = scalar_lea.vmem %s1002_s16, 16  ;;  %s4476_s1 = scalar_lea.vmem %s1002_s16, 32 }
 0x158   : > { %p4470_p10 = scmp.ne.s32.totalorder %s1002_s16, %s4469_s26  ;;  %p4477_p13 = scmp.lt.s32.totalorder %s1002_s16, %s1002_s16 }
 0x159   : > { %p4478_p0 = scmp.lt.s32.totalorder %s4476_s1, %s4469_s26 }
 0x15a   : > { %p4472_p11 = pnand %p4470_p10, %p4983_p8 }
 0x15b   : > { %p4479_p2 = por %p4478_p0, %p4477_p13 }
 0x15c   : > { %p4473_p12 = pneg %p4472_p11 }
 0x15e   : > { %p4480_p5 = pnand %p4479_p2, %p4473_p12 }
 0x160   : > { %4483 = shalt.err (!%p4480_p5)
}
 0x161   : > { %3910 = dma.hbm_to_vmem [thread:$0]  (!%p4971_p6), %s4887_s13, 16, %s1002_s16, [#allocation18]  }
 0x162   : > { %s4484_s15 = scalar_lea.hbm %s5650_s8, 16 }
 0x163   : > { %p4485_p7 = scmp.ne.s32.totalorder %s5650_s8, %s4484_s15  ;;  %p4491_p3 = scmp.lt.u32.totalorder %s4484_s15, %s5650_s8 }
 0x165   : > { %p4487_p4 = pnand %p4485_p7, %p4983_p8 }
 0x167   : > { %p4488_p1 = pneg %p4487_p4 }
 0x169   : > { %p4493_p9 = pnand %p4491_p3, %p4488_p1 }
 0x16b   : > { %4496 = shalt.err (!%p4493_p9)
}
 0x16c   : > { %s4497_s23 = scalar_lea.vmem %s1026_s2, 16  ;;  %s4504_s17 = scalar_lea.vmem %s1026_s2, 32 }
 0x16d   : > { %p4498_p10 = scmp.ne.s32.totalorder %s1026_s2, %s4497_s23  ;;  %p4505_p13 = scmp.lt.s32.totalorder %s1026_s2, %s1026_s2 }
 0x16e   : > { %p4506_p0 = scmp.lt.s32.totalorder %s4504_s17, %s4497_s23 }
 0x16f   : > { %p4500_p11 = pnand %p4498_p10, %p4983_p8 }
 0x170   : > { %p4507_p2 = por %p4506_p0, %p4505_p13 }
 0x171   : > { %p4501_p12 = pneg %p4500_p11 }
 0x173   : > { %p4508_p5 = pnand %p4507_p2, %p4501_p12 }
 0x175   : > { %4511 = shalt.err (!%p4508_p5)
}
 0x176   : > { %3916 = dma.hbm_to_vmem [thread:$0]  (!%p4971_p6), %s5650_s8, 16, %s1026_s2, [#allocation21]  }
 0x177   : > { %s4746_s16 = smov [#allocation25]   ;;  %s4747_s20 = smov [#allocation26]  }
 0x178   : > { %s1050_s4 = sshll.u32 %s4746_s16, 4  ;;  %s1061_s26 = sshll.u32 %s4747_s20, 4  ;;  %s1051_s4 = int_to_ptr.vmem [resolvable:$true] %s1050_s4  ;;  %s1062_s26 = int_to_ptr.vmem [resolvable:$true] %s1061_s26 }
 0x179   : > { %s4512_s1 = scalar_lea.hbm %s5652_s5, 16 }
 0x17a   : > { %p4513_p7 = scmp.ne.s32.totalorder %s5652_s5, %s4512_s1  ;;  %p4519_p3 = scmp.lt.u32.totalorder %s4512_s1, %s5652_s5 }
 0x17c   : > { %p4515_p4 = pnand %p4513_p7, %p4983_p8 }
 0x17e   : > { %p4516_p1 = pneg %p4515_p4 }
 0x180   : > { %p4521_p9 = pnand %p4519_p3, %p4516_p1 }
 0x182   : > { %4524 = shalt.err (!%p4521_p9)
}
 0x183   : > { %s4525_s15 = scalar_lea.vmem %s1051_s4, 16  ;;  %s4532_s2 = scalar_lea.vmem %s1051_s4, 32 }
 0x184   : > { %p4526_p10 = scmp.ne.s32.totalorder %s1051_s4, %s4525_s15  ;;  %p4533_p13 = scmp.lt.s32.totalorder %s1051_s4, %s1051_s4 }
 0x185   : > { %p4534_p0 = scmp.lt.s32.totalorder %s4532_s2, %s4525_s15 }
 0x186   : > { %p4528_p11 = pnand %p4526_p10, %p4983_p8 }
 0x187   : > { %p4535_p2 = por %p4534_p0, %p4533_p13 }
 0x188   : > { %p4529_p12 = pneg %p4528_p11 }
 0x18a   : > { %p4536_p5 = pnand %p4535_p2, %p4529_p12 }
 0x18c   : > { %4539 = shalt.err (!%p4536_p5)
}
 0x18d   : > { %3922 = dma.hbm_to_vmem [thread:$0]  (!%p4971_p6), %s5652_s5, 16, %s1051_s4, [#allocation24]  }
 0x18e   : > { %s4540_s23 = scalar_lea.hbm %s5653_s3, 16 }
 0x18f   : > { %p4541_p7 = scmp.ne.s32.totalorder %s5653_s3, %s4540_s23  ;;  %p4547_p3 = scmp.lt.u32.totalorder %s4540_s23, %s5653_s3 }
 0x191   : > { %p4543_p4 = pnand %p4541_p7, %p4983_p8 }
 0x193   : > { %p4544_p1 = pneg %p4543_p4 }
 0x195   : > { %p4549_p9 = pnand %p4547_p3, %p4544_p1 }
 0x197   : > { %4552 = shalt.err (!%p4549_p9)
}
 0x198   : > { %s4553_s17 = scalar_lea.vmem %s1062_s26, 16  ;;  %s4560_s16 = scalar_lea.vmem %s1062_s26, 32 }
 0x199   : > { %p4554_p10 = scmp.ne.s32.totalorder %s1062_s26, %s4553_s17  ;;  %p4561_p13 = scmp.lt.s32.totalorder %s1062_s26, %s1062_s26 }
 0x19a   : > { %p4562_p0 = scmp.lt.s32.totalorder %s4560_s16, %s4553_s17 }
 0x19b   : > { %p4556_p11 = pnand %p4554_p10, %p4983_p8 }
 0x19c   : > { %p4563_p2 = por %p4562_p0, %p4561_p13 }
 0x19d   : > { %p4557_p12 = pneg %p4556_p11 }
 0x19f   : > { %p4564_p5 = pnand %p4563_p2, %p4557_p12 }
 0x1a1   : > { %4567 = shalt.err (!%p4564_p5)
}
 0x1a2   : > { %3925 = dma.hbm_to_vmem [thread:$0]  (!%p4971_p6), %s5653_s3, 16, %s1062_s26, [#allocation27]  }
 0x1a3   : > { %s3454_s29 = sadd.s32 4294967294, %s4696_s0   ;;  %s5167_s4 = sadd.s32 1, %s4696_s0  }
 0x1a4   : > { %s177_s28 = sadd.s32 1, %s4692_s11  ;;  %s174_s20 = ssub.s32 %s4696_s0, %s5167_s4 }
 0x1a5   : > { %s5660_s1 = sld [smem:[#allocation42_spill]]  ;;  %p184_p8 = scmp.ne.s32.totalorder %s4692_s11, %s4688_s10 }
 0x1a6   : > { %p175_p7 = scmp.eq.s32.totalorder %s174_s20, 0  ;;  %p185_p4 = scmp.eq.s32.totalorder %s4696_s0, 0 }
 0x1a7   : > { %p190_p1 = scmp.ne.s32.totalorder %s4688_s10, %s4684_s7  ;;  %p786_p3 = scmp.eq.s32.totalorder %s4955_s18, 1 }
 0x1a8   : > { %s5179_s15 = scalar_select %p175_p7, %s4692_s11, %s177_s28  }
 0x1a9   : > { %p186_p9 = por %p185_p4, %p184_p8  ;;  %p5661_p10 = scmp.eq.s32.totalorder %s4955_s18, 0 }
 0x1aa   : > { %p5187_p6 = por %p786_p3, %p184_p8  ;;  %p792_p12 = scmp.eq.s32.totalorder %s3454_s29, 1 }
 0x1ab   : > { %p5183_p11 = por %p5661_p10, %p190_p1  ;;  %p3949_p13 = scmp.lt.s32.totalorder %s4696_s0, 2 }
 0x1ac   : > { %s5663_s2 = scalar_select %p5187_p6, 1, 0 }
 0x1ad   : > { %s5662_s26 = scalar_select %p5183_p11, 1, 0 }
 0x1ae   : > { %s1094_s23 = sand.u32 1, %s4692_s11   ;;  %p5193_p0 = por %p792_p12, %p190_p1 }
 0x1af   : > { %s3472_s16 = sshll.u32 %s1094_s23, 3  ;;  %s3473_s28 = sshll.u32 %s4696_s0, 7 }
 0x1b0   : > { %s5664_s17 = scalar_select %p5193_p0, 1, 0 }
 0x1b1   : > { %s5199_s20 = scalar_lea.hbm %s5660_s1, %s3473_s28  ;;  %s1098_s3 = scalar_lea.vmem [#allocation2], %s3472_s16 }
 0x1b2   : > { %s1105_s5 = sshll.u32 %s1098_s3, 4  ;;  %p5201_p2 = pnand %p3949_p13, %p186_p9  ;;  %s5205_s5 = int_to_ptr.vmem [resolvable:$true] %s1105_s5 }
 0x1b3   : > { %s1095_s6 = scalar_lea.sflag [#allocation3], %s1094_s23  ;;  %s4568_s8 = scalar_lea.hbm %s5199_s20, 128 }
 0x1b4   : > { %p4569_p5 = scmp.ne.s32.totalorder %s5199_s20, %s4568_s8  ;;  %p4570_p8 = pneg %p5201_p2 }
 0x1b5   : > { %s4573_s28 = scalar_lea.hbm %s5660_s1, 256  ;;  %p4574_p1 = scmp.lt.u32.totalorder %s5199_s20, %s5660_s1 }
 0x1b6   : > { %p4571_p7 = pnand %p4570_p8, %p4569_p5  ;;  %p4575_p3 = scmp.lt.u32.totalorder %s4573_s28, %s4568_s8 }
 0x1b7   : > { %p4577_p10 = scmp.lt.u32.totalorder %s4568_s8, %s5199_s20 }
 0x1b8   : > { %p4572_p4 = pneg %p4571_p7  ;;  %p4576_p9 = por %p4575_p3, %p4574_p1 }
 0x1ba   : > { %p4578_p12 = por %p4577_p10, %p4576_p9 }
 0x1bc   : > { %p4579_p13 = pnand %p4578_p12, %p4572_p4 }
 0x1be   : > { %4582 = shalt.err (!%p4579_p13)
}
 0x1bf   : > { %s4583_s3 = scalar_lea.vmem %s5205_s5, 128  ;;  %s4748_s23 = smov [#allocation2]  }
 0x1c0   : > { %p4584_p0 = scmp.ne.s32.totalorder %s5205_s5, %s4583_s3  ;;  %s4588_s16 = sshll.u32 %s4748_s23, 4  ;;  %s4589_s16 = int_to_ptr.vmem [resolvable:$false] %s4588_s16 }
 0x1c1   : > { %s4590_s1 = scalar_lea.vmem %s4589_s16, 256  ;;  %p4591_p5 = scmp.lt.s32.totalorder %s5205_s5, %s4589_s16 }
 0x1c2   : > { %p4586_p6 = pnand %p4584_p0, %p4570_p8  ;;  %p4592_p7 = scmp.lt.s32.totalorder %s4590_s1, %s4583_s3 }
 0x1c4   : > { %p4587_p11 = pneg %p4586_p6  ;;  %p4593_p1 = por %p4592_p7, %p4591_p5 }
 0x1c6   : > { %p4594_p3 = pnand %p4593_p1, %p4587_p11 }
 0x1c8   : > { %4597 = shalt.err (!%p4594_p3)
}
 0x1c9   : > { %3929 = dma.hbm_to_vmem [thread:$0]  (!%p5201_p2), %s5199_s20, 128, %s5205_s5, %s1095_s6  }
 0x1ca   : > { %p5666_p4 = scmp.ne.s32.totalorder %s5656_s22, 0 }
 0x1cb   : > { %s5231_s8 = sand.u32 (!%p5666_p4), 1, %s4688_s10   ;;  %p5667_p11 = scmp.ne.s32.totalorder (!%p5666_p4), %s5662_s26, 0 }
 0x1cc   : > { %1121 = sbr.rel (%p5666_p4) target bundleno = 4790 (0x12b6), region = 144  ;;  %s5610_s28 = sshll.u32 (!%p5666_p4), %s5231_s8, 3 }
 0x1cd   : > { %s1124_s1 = scalar_lea.sflag (!%p5666_p4), [#allocation3], %s5231_s8  ;;  %s5237_s3 = scalar_lea.vmem (!%p5666_p4), [#allocation2], %s5610_s28 }
 0x1d3   : > { %4643 = dma.done.wait (%p5667_p11), %s1124_s1, 128  }
 0x1d4   : > { %4645 = vsyncadd (%p5667_p11), %s1124_s1, 4294967168  ;;  %p5668_p6 = scmp.eq.s32.totalorder %s4955_s18, 0 }
 0x1d6   : > { %4647 = dma.done.wait (%p5668_p6), [#allocation6], 272   ;;  %p5669_p0 = pmov %p5668_p6 }
 0x1d8   : > { %4649 = vsyncadd (%p5669_p0), [#allocation6], 4294967024  ;;  %p5670_p2 = pmov %p5669_p0 }
 0x1d9   : > { %p5671_p8 = pmov %p5669_p0 }
 0x1da   : > { %4651 = dma.done.wait (%p5670_p2), [#allocation9], 272  }
 0x1db   : > { %4653 = vsyncadd (%p5671_p8), [#allocation9], 4294967024  ;;  %p5672_p9 = pmov %p5669_p0 }
 0x1dc   : > { %p5673_p10 = pmov %p5669_p0 }
 0x1dd   : > { %4655 = dma.done.wait (%p5672_p9), [#allocation12], 272  }
 0x1de   : > { %4657 = vsyncadd (%p5673_p10), [#allocation12], 4294967024  ;;  %p5674_p12 = pmov %p5669_p0 }
 0x1df   : > { %p5675_p13 = pmov %p5669_p0 }
 0x1e0   : > { %4659 = dma.done.wait (%p5674_p12), [#allocation15], 272  }
 0x1e1   : > { %4661 = vsyncadd (%p5675_p13), [#allocation15], 4294967024  ;;  %p5676_p5 = pmov %p5669_p0 }
 0x1e2   : > { %p5677_p7 = pmov %p5669_p0 }
 0x1e3   : > { %4663 = dma.done.wait (%p5676_p5), [#allocation18], 32  }
 0x1e4   : > { %4665 = vsyncadd (%p5677_p7), [#allocation18], 4294967264  ;;  %p5678_p1 = pmov %p5669_p0 }
 0x1e5   : > { %p5679_p3 = pmov %p5669_p0 }
 0x1e6   : > { %4667 = dma.done.wait (%p5678_p1), [#allocation21], 272  }
 0x1e7   : > { %4669 = vsyncadd (%p5679_p3), [#allocation21], 4294967024  ;;  %p5680_p4 = pmov %p5669_p0 }
 0x1e8   : > { %p5681_p11 = pmov %p5669_p0 }
 0x1e9   : > { %4671 = dma.done.wait (%p5680_p4), [#allocation24], 32  }
 0x1ea   : > { %4673 = vsyncadd (%p5681_p11), [#allocation24], 4294967264  ;;  %p5682_p6 = pmov %p5669_p0 }
 0x1ec   : > { %4675 = dma.done.wait (%p5682_p6), [#allocation27], 16  }
 0x1ed   : > { %4677 = vsyncadd (%p5669_p0), [#allocation27], 4294967280  ;;  %s5683_s5 = sld [smem:[#allocation44_spill]]  ;;  %s5684_s6 = sld [smem:[#allocation46_spill]]  ;;  %v4749_v0 = vmov 0.0   ;;  %vm4750_vm0 = vmmov 0  }
 0x1ee   : > { %s5685_s22 = sld [smem:[#allocation39_spill]]  ;;  %p1297_p2 = scmp.lt.s32.totalorder %s4955_s18, 1  ;;  %3636 = vmatprep.subr.bf16.mxu0 %v4749_v0  ;;  %3644 = vmatprep.subr.bf16.mxu1 %v4749_v0  ;;  %vm1371_vm1 = vcmask 261120   ;;  %vm1571_vm2 = vcmask 64512   ;;  %vm1811_vm3 = vcmask 1043456   ;;  %vm2006_vm4 = vcmask 130048  }
 0x1ef   : > { %3640 = vmatprep.mubr.msk.bf16.mxu0 %vm4750_vm0, %v4749_v0  ;;  %3648 = vmatprep.mubr.msk.bf16.mxu1 %vm4750_vm0, %v4749_v0  ;;  %s5686_s23 = sld [smem:[#allocation48_spill]]  ;;  %s5687_s16 = sld [smem:[#allocation45_spill]]  ;;  %vm2008_vm5 = vcmask 195584   ;;  %vm3004_vm6 = vcmask 523264  }
 0x1f0   : > { %s5283_s26 = scalar_select %p1297_p2, %s4955_s18, 1 }
 0x1f1   : > { %s5688_s1 = sld [smem:[#allocation47_spill]]  ;;  %p5708_p9 = scmp.ne.s32.totalorder %s5663_s2, 0 }
 0x1f2   : > { %s5286_s20 = sshll.u32 %s5283_s26, 3 }
 0x1f3   : > { %v4088_v1 = vld [vmem:[%s5683_s5] sm:$0xff]   ;;  %v4090_v3 = vld [vmem:[%s5683_s5 + $0x8] sm:$0xff]   ;;  %s3081_s5 = scalar_lea.sflag [#allocation4], %s5231_s8 }
 0x1f4   : > { %v4089_v2 = vld [vmem:[%s5684_s6] sm:$0xff]   ;;  %s1300_s29 = scalar_lea.vmem %s5685_s22, %s5286_s20  ;;  %3637 = vmatpush3.bf16.msra.mxu0 %v4088_v1  ;;  %v4091_v4 = vld [vmem:[%s5684_s6 + $0x8] sm:$0xff]   ;;  %s5616_s22 = smov 120  }
 0x1f5   : > { %3645 = vmatpush3.bf16.msra.mxu1 %v4089_v2  ;;  %3638 = vmatprep.subr.bf16.mxu0 %v4749_v0  ;;  %v5296_v5 = vld [vmem:[%s1300_s29] sm:$0xff]  ;;  %v4093_v8 = vld [vmem:[%s5686_s23 + $0x8] sm:$0xff]   ;;  %s5614_s29 = smov 112  }
 0x1f6   : > { %3646 = vmatprep.subr.bf16.mxu1 %v4749_v0  ;;  %v1352_v6 = vpack.c.bf16 %v5296_v5, %v5296_v5  ;;  %v4092_v7 = vld [vmem:[%s5686_s23] sm:$0xff]  }
 0x1f7   : > { %v3501_v9 = vld [vmem:[%s5687_s16] ss:$0 sm:$0xff]  ;;  %s5689_s16 = sld [smem:[#allocation49_spill]] }
 0x1f8   : > { %3639 = vmatpush3.bf16.msra.mxu0 %v4090_v3  ;;  %v3505_v10 = vld [vmem:[%s5688_s1] ss:$0 sm:$0xff]  ;;  %s5612_s1 = smov 104  }
 0x1f9   : > { %3647 = vmatpush3.bf16.msra.mxu1 %v4091_v4  ;;  %3652 = vmatprep.subr.bf16.mxu0 %v4749_v0 }
 0x1fa   : > { %3660 = vmatprep.subr.bf16.mxu1 %v4749_v0 }
 0x1fb   : > { %3641 = vmatmul.mubr.msk.bf16.vlgmr.msra.gmra.mrb[0].mxu0 %vm1371_vm1, %v1352_v6 }
 0x1fc   : > { %3649 = vmatmul.mubr.msk.bf16.vlgmr.msra.gmra.mrb[0].mxu1 %vm1371_vm1, %v1352_v6  ;;  %3656 = vmatprep.mubr.msk.bf16.mxu0 %vm4750_vm0, %v4749_v0 }
 0x1fd   : > { %3662 = vmatprep.mubr.msk.bf16.mxu1 %vm4750_vm0, %v4749_v0  ;;  %3653 = vmatpush3.bf16.msra.mxu0 %v4092_v7  ;;  %v3509_v32 = vld [vmem:[%s5689_s16] ss:$0 sm:$0xff]  ;;  %s5690_s16 = sld [smem:[#allocation41_spill]] }
 0x1fe   : > { %3654 = vmatprep.subr.bf16.mxu0 %v4749_v0 }
 0x201   : > { %3655 = vmatpush3.bf16.msra.mxu0 %v4093_v8 }
 0x202   : > { %3666 = vmatprep.subr.bf16.mxu0 %v4749_v0 }
 0x203   : > { %s1309_s28 = scalar_lea.vmem %s5690_s16, %s5286_s20 }
 0x204   : > { %3657 = vmatmul.mubr.msk.bf16.vlgmr.msra.gmra.mrb[4].mxu0 %vm1371_vm1, %v1352_v6  ;;  %v1329_v48 = vld [vmem:[%s1309_s28] sm:$0xff]  ;;  %s5611_s28 = sshll.u32 %s5283_s26, 5 }
 0x205   : > { %3668 = vmatprep.mubr.msk.bf16.mxu0 %vm4750_vm0, %v4749_v0  ;;  %v1570_v49 = vmul.f32 -1e+09, %v1329_v48  ;;  %s5372_s16 = scalar_lea.vmem %s4927_s25, %s5611_s28  ;;  %s5691_s28 = sld [smem:[#allocation50_spill]] }
 0x2ce   : > { %v1409_v11 = vpop.f32.mrb[0].mxu0 }
 0x2cf   : > { %v1410_v12 = vadd.f32 %v3501_v9, %v1409_v11  ;;  %v1467_v13 = vpop.f32.mrb[0].mxu1  ;;  %v3642_v14 = vpop.f32.mrb[1].mxu0 }
 0x2d0   : > { %v1468_v15 = vadd.f32 %v3505_v10, %v1467_v13  ;;  %v3650_v16 = vpop.f32.mrb[1].mxu1  ;;  %v1412_v17 = vpop.f32.mrb[2].mxu0 }
 0x2d1   : > { %v1531_v18 = vmul.f32 0.35355338, %v1410_v12  ;;  %v1470_v19 = vpop.f32.mrb[2].mxu1  ;;  %v3643_v20 = vpop.f32.mrb[3].mxu0 }
 0x2d2   : > { %1543 = vrot.lane.b32.xlu0 %v1468_v15, %s5616_s22  ;;  %v3651_v21 = vpop.f32.mrb[3].mxu1  ;;  %v1566_v22 = vpack.c.bf16 %v1468_v15, %v1468_v15 }
 0x2d3   : > { %1533 = vrot.lane.b32.xlu1 %v1531_v18, %s5616_s22  ;;  %v1562_v24 = vpack.c.bf16 %v1531_v18, %v1531_v18 }
 0x2d4   : > { %v1576_v23 = vsel %vm1571_vm2, %v1566_v22, 0 }
 0x2d5   : > { %3661 = vmatpush3.bf16.xpose.msra.mxu1 %v1576_v23 }
 0x2d6   : > { %1546 = vrot.lane.b32.xlu0 %v1468_v15, %s5614_s29  ;;  %3672 = vmatprep.subr.bf16.mxu1 %v4749_v0 }
 0x2d7   : > { %1549 = vrot.lane.b32.xlu1 %v1468_v15, %s5612_s1  ;;  %v1525_v25 = vpop.f32.mrb[4].mxu0 }
 0x2d8   : > { %v3658_v26 = vpop.f32.mrb[5].mxu0  ;;  %v5331_v37 = vadd.f32 %v3509_v32, %v1525_v25 }
 0x2d9   : > { %v1528_v27 = vpop.f32.mrb[6].mxu0 }
 0x2da   : > { %1536 = vrot.lane.b32.xlu0 %v1531_v18, %s5614_s29  ;;  %v3659_v28 = vpop.f32.mrb[7].mxu0  ;;  %v1804_v41 = vpack.c.bf16 %v5331_v37, %v5331_v37 }
 0x2db   : > { %1539 = vrot.lane.b32.xlu1 %v1531_v18, %s5612_s1 }
 0x2dc   : > { %3663 = vmatmul.mubr.msk.bf16.vlgmr.msra.gmra.mrb[4].mxu1 %vm1571_vm2, %v1562_v24  ;;  %v1813_v45 = vsel %vm1811_vm3, %v1804_v41, 0 }
 0x2dd   : > { %3674 = vmatprep.mubr.msk.bf16.mxu1 %vm4750_vm0, %v4749_v0 }
 0x344   : > { %v1544_v29 = vpop.permute.xlu0 %1543 }
 0x345   : > { %v1567_v30 = vpack.c.bf16 %v1544_v29, %v1544_v29  ;;  %v1534_v31 = vpop.permute.xlu1 %1533 }
 0x346   : > { %v1563_v40 = vpack.c.bf16 %v1534_v31, %v1534_v31 }
 0x347   : > { %v1622_v33 = vsel %vm1571_vm2, %v1567_v30, 0 }
 0x348   : > { %v1547_v34 = vpop.permute.xlu0 %1546  ;;  %3667 = vmatpush3.bf16.xpose.msra.mxu0 %v1622_v33 }
 0x349   : > { %v1568_v35 = vpack.c.bf16 %v1547_v34, %v1547_v34  ;;  %v1550_v36 = vpop.permute.xlu1 %1549  ;;  %3678 = vmatprep.subr.bf16.mxu0 %v4749_v0 }
 0x34a   : > { %v1569_v39 = vpack.c.bf16 %v1550_v36, %v1550_v36 }
 0x34b   : > { %v1668_v38 = vsel %vm1571_vm2, %v1568_v35, 0 }
 0x34c   : > { %3673 = vmatpush3.bf16.xpose.msra.mxu1 %v1668_v38  ;;  %v1537_v42 = vpop.permute.xlu0 %1536  ;;  %v1714_v43 = vsel %vm1571_vm2, %v1569_v39, 0 }
 0x34d   : > { %3684 = vmatprep.subr.bf16.mxu1 %v4749_v0  ;;  %v1564_v44 = vpack.c.bf16 %v1537_v42, %v1537_v42  ;;  %v1540_v46 = vpop.permute.xlu1 %1539 }
 0x34e   : > { %v1565_v47 = vpack.c.bf16 %v1540_v46, %v1540_v46 }
 0x34f   : > { %3669 = vmatmul.mubr.msk.bf16.vlgmr.msra.gmra.mrb[8].mxu0 %vm1571_vm2, %v1563_v40 }
 0x350   : > { %3679 = vmatpush3.bf16.xpose.msra.mxu0 %v1714_v43  ;;  %3680 = vmatprep.mubr.msk.bf16.mxu0 %vm4750_vm0, %v4749_v0 }
 0x351   : > { %3690 = vmatprep.subr.bf16.mxu0 %v4749_v0 }
 0x353   : > { %3675 = vmatmul.mubr.msk.bf16.vlgmr.msra.gmra.mrb[8].mxu1 %vm1571_vm2, %v1564_v44 }
 0x354   : > { %3685 = vmatpush3.bf16.msra.mxu1 %v1813_v45  ;;  %3686 = vmatprep.mubr.msk.bf16.mxu1 %vm4750_vm0, %v4749_v0 }
 0x355   : > { %3696 = vmatprep.subr.bf16.mxu1 %v4749_v0 }
 0x357   : > { %3681 = vmatmul.mubr.msk.bf16.vlgmr.msra.gmra.mrb[12].mxu0 %vm1571_vm2, %v1565_v47 }
 0x358   : > { %3692 = vmatprep.mubr.msk.bf16.mxu0 %vm4750_vm0, %v4749_v0 }
 0x3af   : > { %v1612_v50 = vpop.f32.mrb[4].mxu1 }
 0x3b0   : > { %v1613_v51 = vadd.f32 %v1612_v50, %v1570_v49  ;;  %v3664_v52 = vpop.f32.mrb[5].mxu1 }
 0x3b1   : > { %v1615_v53 = vpop.f32.mrb[6].mxu1 }
 0x3b2   : > { %v3665_v54 = vpop.f32.mrb[7].mxu1  ;;  %v1756_v55 = vsel %vm1571_vm2, %v1613_v51, -inf }
 0x3b3   : > { %1757 = vmax.xlane.f32.xlu0 %v1756_v55 }
 0x422   : > { %v1658_v56 = vpop.f32.mrb[8].mxu0 }
 0x423   : > { %v1659_v57 = vadd.f32 %v1658_v56, %v1570_v49  ;;  %v3670_v58 = vpop.f32.mrb[9].mxu0 }
 0x424   : > { %v1661_v59 = vpop.f32.mrb[10].mxu0 }
 0x425   : > { %v3671_v60 = vpop.f32.mrb[11].mxu0  ;;  %v1759_v61 = vsel %vm1571_vm2, %v1659_v57, -inf }
 0x426   : > { %v1704_v62 = vpop.f32.mrb[8].mxu1  ;;  %1760 = vmax.xlane.f32.xlu1 %v1759_v61  ;;  %v4094_v61 = vld [vmem:[%s5691_s28] sm:$0xff]  }
 0x427   : > { %v1705_v63 = vadd.f32 %v1704_v62, %v1570_v49  ;;  %v3676_v1 = vpop.f32.mrb[9].mxu1  ;;  %v4095_v62 = vld [vmem:[%s5691_s28 + $0x8] sm:$0xff]  }
 0x428   : > { %v1707_v2 = vpop.f32.mrb[10].mxu1 }
 0x429   : > { %v3677_v3 = vpop.f32.mrb[11].mxu1  ;;  %v1762_v4 = vsel %vm1571_vm2, %v1705_v63, -inf }
 0x42a   : > { %1763 = vmax.xlane.f32.xlu0 %v1762_v4  ;;  %v1750_v6 = vpop.f32.mrb[12].mxu0 }
 0x42b   : > { %v1751_v7 = vadd.f32 %v1750_v6, %v1570_v49  ;;  %v3682_v8 = vpop.f32.mrb[13].mxu0 }
 0x42c   : > { %v1753_v9 = vpop.f32.mrb[14].mxu0 }
 0x42d   : > { %v3683_v10 = vpop.f32.mrb[15].mxu0  ;;  %v1765_v11 = vsel %vm1571_vm2, %v1751_v7, -inf }
 0x42e   : > { %1766 = vmax.xlane.f32.xlu0 %v1765_v11 }
 0x437   : > { %1553 = vrot.lane.b32.xlu1 %v5331_v37, %s5616_s22  ;;  %s5692_s22 = sld [smem:[#allocation51_spill]] }
 0x440   : > { %v1758_v12 = vpop.xlane.xlu0 %1757 }
 0x441   : > { %v1768_v13 = vsub.f32 %v1613_v51, %v1758_v12 }
 0x443   : > { %v1772_v14 = vmul.f32 1.442695, %v1768_v13 }
 0x445   : > { %4110 = vpow2.f32 %v1772_v14 }
 0x44f   : > { %v4111_v15 = vpop.eup %4110 }
 0x450   : > { %v1780_v16 = vsel %vm1571_vm2, %v4111_v15, 0.0 }
 0x45b   : > { %1781 = vadd.xlane.f32.xlu1 %v1780_v16 }
 0x4b3   : > { %v1761_v17 = vpop.xlane.xlu1 %1760 }
 0x4b4   : > { %v1769_v18 = vsub.f32 %v1659_v57, %v1761_v17 }
 0x4b6   : > { %v1774_v19 = vmul.f32 1.442695, %v1769_v18 }
 0x4b7   : > { %v1764_v20 = vpop.xlane.xlu0 %1763  ;;  %v1554_v21 = vpop.permute.xlu1 %1553 }
 0x4b8   : > { %4112 = vpow2.f32 %v1774_v19  ;;  %v1770_v22 = vsub.f32 %v1705_v63, %v1764_v20  ;;  %v1805_v23 = vpack.c.bf16 %v1554_v21, %v1554_v21  ;;  %v3521_v20 = vld [vmem:[%s5692_s22] ss:$0 sm:$0xff] }
 0x4ba   : > { %v1776_v24 = vmul.f32 1.442695, %v1770_v22  ;;  %v1859_v25 = vsel %vm1811_vm3, %v1805_v23, 0 }
 0x4bb   : > { %3691 = vmatpush3.bf16.msra.mxu0 %v1859_v25  ;;  %v1767_v26 = vpop.xlane.xlu0 %1766 }
 0x4bc   : > { %4114 = vpow2.f32 %v1776_v24  ;;  %v1771_v27 = vsub.f32 %v1751_v7, %v1767_v26  ;;  %3702 = vmatprep.subr.bf16.mxu0 %v4749_v0 }
 0x4be   : > { %v1778_v28 = vmul.f32 1.442695, %v1771_v27 }
 0x4c0   : > { %4116 = vpow2.f32 %v1778_v28  ;;  %v4096_v28 = vld [vmem:[#allocation8] sm:$0xff]  }
 0x4c2   : > { %v4113_v29 = vpop.eup %4112 }
 0x4c3   : > { %v1783_v30 = vsel %vm1571_vm2, %v4113_v29, 0.0 }
 0x4c4   : > { %1784 = vadd.xlane.f32.xlu0 %v1783_v30 }
 0x4c6   : > { %v4115_v31 = vpop.eup %4114 }
 0x4c7   : > { %v1786_v32 = vsel %vm1571_vm2, %v4115_v31, 0.0 }
 0x4c8   : > { %1787 = vadd.xlane.f32.xlu1 %v1786_v32 }
 0x4ca   : > { %v4117_v33 = vpop.eup %4116 }
 0x4cb   : > { %v1789_v34 = vsel %vm1571_vm2, %v4117_v33, 0.0 }
 0x4cc   : > { %1790 = vadd.xlane.f32.xlu0 %v1789_v34 }
 0x4d9   : > { %1559 = vrot.lane.b32.xlu1 %v5331_v37, %s5612_s1  ;;  %s5618_s1 = smov 16  }
 0x4e2   : > { %1556 = vrot.lane.b32.xlu0 %v5331_v37, %s5614_s29  ;;  %s5619_s29 = smov 24  }
 0x4e8   : > { %v1782_v35 = vpop.xlane.xlu1 %1781 }
 0x4e9   : > { %4118 = vrcp.f32 %v1782_v35 }
 0x4f3   : > { %v4119_v36 = vpop.eup %4118 }
 0x4f4   : > { %v1796_v38 = vmul.f32 %v4119_v36, %v4111_v15 }
 0x4f6   : > { %2107 = vst.msk [vmem:[%s5372_s16] sm:$0xff] %vm1571_vm2, %v1796_v38  ;;  %v1800_v39 = vpack.c.bf16 %v1796_v38, %v1796_v38 }
 0x4f8   : > { %3687 = vmatmul.mubr.msk.bf16.vlgmr.msra.gmra.mrb[12].mxu1 %vm1571_vm2, %v1800_v39 }
 0x4f9   : > { %3698 = vmatprep.mubr.msk.bf16.mxu1 %vm4750_vm0, %v4749_v0 }
 0x551   : > { %v1785_v40 = vpop.xlane.xlu0 %1784 }
 0x552   : > { %4120 = vrcp.f32 %v1785_v40  ;;  %v4098_v40 = vld [vmem:[#allocation5] sm:$0xff]  }
 0x555   : > { %v1788_v37 = vpop.xlane.xlu1 %1787 }
 0x556   : > { %4122 = vrcp.f32 %v1788_v37  ;;  %v4099_v37 = vld [vmem:[#allocation5 + $0x8] sm:$0xff]  }
 0x559   : > { %v1791_v41 = vpop.xlane.xlu0 %1790  ;;  %v1560_v42 = vpop.permute.xlu1 %1559 }
 0x55a   : > { %4124 = vrcp.f32 %v1791_v41  ;;  %v1807_v45 = vpack.c.bf16 %v1560_v42, %v1560_v42 }
 0x55c   : > { %v4121_v43 = vpop.eup %4120  ;;  %v1951_v52 = vsel %vm1811_vm3, %v1807_v45, 0 }
 0x55d   : > { %v1797_v44 = vmul.f32 %v4121_v43, %v4113_v29  ;;  %v1557_v46 = vpop.permute.xlu0 %1556  ;;  %v4757_v29 = vmov 0  }
 0x55e   : > { %v1806_v47 = vpack.c.bf16 %v1557_v46, %v1557_v46  ;;  %4057 = vset.pattern.permute.xlu0 %v4757_v29 }
 0x55f   : > { %2108 = vst.msk [vmem:[%s5372_s16 + $0x8] sm:$0xff] %vm1571_vm2, %v1797_v44  ;;  %v1801_v48 = vpack.c.bf16 %v1797_v44, %v1797_v44 }
 0x560   : > { %v4123_v49 = vpop.eup %4122  ;;  %v1905_v50 = vsel %vm1811_vm3, %v1806_v47, 0 }
 0x561   : > { %v1798_v51 = vmul.f32 %v4123_v49, %v4115_v31  ;;  %3693 = vmatmul.mubr.msk.bf16.vlgmr.msra.gmra.mrb[16].mxu0 %vm1571_vm2, %v1801_v48  ;;  %3697 = vmatpush3.bf16.msra.mxu1 %v1905_v50  ;;  %v4097_v31 = vld [vmem:[#allocation8 + $0x8] sm:$0xff]  }
 0x562   : > { %3703 = vmatpush3.bf16.msra.mxu0 %v1951_v52  ;;  %3704 = vmatprep.mubr.msk.bf16.mxu0 %vm4750_vm0, %v4749_v0 }
 0x563   : > { %2109 = vst.msk [vmem:[%s5372_s16 + $0x10] sm:$0xff] %vm1571_vm2, %v1798_v51  ;;  %v1802_v53 = vpack.c.bf16 %v1798_v51, %v1798_v51  ;;  %3708 = vmatprep.subr.bf16.mxu1 %v4749_v0  ;;  %3716 = vmatprep.subr.bf16.mxu0 %v4749_v0 }
 0x564   : > { %v4125_v54 = vpop.eup %4124 }
 0x565   : > { %v1799_v55 = vmul.f32 %v4125_v54, %v4117_v33  ;;  %3699 = vmatmul.mubr.msk.bf16.vlgmr.msra.gmra.mrb[16].mxu1 %vm1571_vm2, %v1802_v53  ;;  %v3531_v53 = vld [vmem:[#allocation10] ss:$0 sm:$0xff] }
 0x566   : > { %3712 = vmatprep.mubr.msk.bf16.mxu1 %vm4750_vm0, %v4749_v0  ;;  %3709 = vmatpush3.bf16.msra.mxu1 %v4094_v61 }
 0x567   : > { %2110 = vst.msk [vmem:[%s5372_s16 + $0x18] sm:$0xff] %vm1571_vm2, %v1799_v55  ;;  %v1803_v56 = vpack.c.bf16 %v1799_v55, %v1799_v55  ;;  %3710 = vmatprep.subr.bf16.mxu1 %v4749_v0  ;;  %s5620_s16 = smov 8  }
 0x569   : > { %3705 = vmatmul.mubr.msk.bf16.vlgmr.msra.gmra.mrb[20].mxu0 %vm1571_vm2, %v1803_v56 }
 0x56a   : > { %3720 = vmatprep.mubr.msk.bf16.mxu0 %vm4750_vm0, %v4749_v0  ;;  %3711 = vmatpush3.bf16.msra.mxu1 %v4095_v62 }
 0x56b   : > { %3724 = vmatprep.subr.bf16.mxu1 %v4749_v0  ;;  %3717 = vmatpush3.bf16.msra.mxu0 %v4098_v40  ;;  %v2111_v40 = vld [vmem:[%s5237_s3] sm:$0xff]  ;;  %s5700_s3 = sld [smem:[#allocation63_spill]] }
 0x56c   : > { %3718 = vmatprep.subr.bf16.mxu0 %v4749_v0 }
 0x56f   : > { %3719 = vmatpush3.bf16.msra.mxu0 %v4099_v37  ;;  %v2377_v37 = vmul.f32 -1e+09, %v2111_v40 }
 0x570   : > { %3732 = vmatprep.subr.bf16.mxu0 %v4749_v0 }
 0x5cb   : > { %v1849_v57 = vpop.f32.mrb[12].mxu1 }
 0x5cc   : > { %v3688_v58 = vpop.f32.mrb[13].mxu1 }
 0x5cd   : > { %v1852_v59 = vpop.f32.mrb[14].mxu1 }
 0x5ce   : > { %v3689_v60 = vpop.f32.mrb[15].mxu1 }
 0x634   : > { %v1895_v63 = vpop.f32.mrb[16].mxu0 }
 0x635   : > { %1994 = vrot.lane.b32.xlu1 %v1895_v63, %s5620_s16  ;;  %v3694_v1 = vpop.f32.mrb[17].mxu0  ;;  %s5694_s16 = sld [smem:[#allocation40_spill]]  ;;  %v4100_v63 = vld [vmem:[#allocation11] sm:$0xff]  }
 0x636   : > { %v1898_v2 = vpop.f32.mrb[18].mxu0  ;;  %v4101_v1 = vld [vmem:[#allocation11 + $0x8] sm:$0xff]  }
 0x637   : > { %v3695_v3 = vpop.f32.mrb[19].mxu0 }
 0x638   : > { %v1941_v4 = vpop.f32.mrb[16].mxu1 }
 0x639   : > { %1998 = vrot.lane.b32.xlu0 %v1941_v4, %s5618_s1  ;;  %v3700_v6 = vpop.f32.mrb[17].mxu1  ;;  %s5693_s1 = sld [smem:[#allocation43_spill]] }
 0x63a   : > { %v1944_v7 = vpop.f32.mrb[18].mxu1 }
 0x63b   : > { %v3701_v8 = vpop.f32.mrb[19].mxu1 }
 0x63c   : > { %v1987_v9 = vpop.f32.mrb[20].mxu0 }
 0x63d   : > { %2002 = vrot.lane.b32.xlu1 %v1987_v9, %s5619_s29  ;;  %v3706_v10 = vpop.f32.mrb[21].mxu0 }
 0x63e   : > { %v1990_v11 = vpop.f32.mrb[22].mxu0 }
 0x63f   : > { %v3707_v12 = vpop.f32.mrb[23].mxu0  ;;  %s1313_s29 = scalar_lea.vmem %s5693_s1, %s5286_s20  ;;  %s3569_s20 = sshll.u32 %s5283_s26, 4  ;;  %v3527_v11 = vld [vmem:[#allocation7] ss:$0 sm:$0xff] }
 0x640   : > { %v1328_v30 = vld [vmem:[%s1313_s29] sm:$0xff]  ;;  %s1305_s22 = scalar_lea.vmem %s5694_s16, %s3569_s20  ;;  %s5695_s1 = sld [smem:[#allocation52_spill]] }
 0x641   : > { %v1326_v36 = vld [vmem:[%s1305_s22] sm:$0xff]  ;;  %v1327_v38 = vld [vmem:[%s1305_s22 + $0x8] sm:$0xff]  ;;  %s5696_s29 = sld [smem:[#allocation53_spill]]  ;;  %s5697_s16 = smov 120  }
 0x642   : > { %v2196_v39 = vpack.c.bf16 %v1327_v38, %v1326_v36  ;;  %s5698_s20 = smov 112   ;;  %s5699_s22 = smov 104  }
 0x646   : > { %v3525_v45 = vld [vmem:[%s5695_s1] ss:$0 sm:$0xff]  ;;  %s5701_s1 = sshll.u32 %s5283_s26, 5  ;;  %s5702_s26 = smov 8  }
 0x647   : > { %v3526_v47 = vld [vmem:[%s5696_s29] ss:$0 sm:$0xff]  ;;  %s5491_s29 = scalar_lea.vmem %s5700_s3, %s5701_s1  ;;  %s5706_s3 = sld [smem:[#allocation62_spill]] }
 0x648   : > { %s3566_s1 = sshll.u32 %s4955_s18, 7  ;;  %s4758_s18 = smov [#allocation28]  }
 0x6a7   : > { %v1995_v13 = vpop.permute.xlu1 %1994 }
 0x6a8   : > { %v2005_v15 = vsel %vm1571_vm2, %v1849_v57, %v1995_v13 }
 0x6ab   : > { %v1999_v14 = vpop.permute.xlu0 %1998 }
 0x6ac   : > { %v2007_v16 = vsel %vm2006_vm4, %v2005_v15, %v1999_v14 }
 0x6af   : > { %v2003_v17 = vpop.permute.xlu1 %2002 }
 0x6b0   : > { %v2009_v18 = vsel %vm2008_vm5, %v2007_v16, %v2003_v17 }
 0x6b1   : > { %v2010_v19 = vpack.c.bf16 %v2009_v18, %v2009_v18 }
 0x6b3   : > { %3713 = vmatmul.mubr.msk.bf16.vlgmr.msra.gmra.mrb[20].mxu1 %vm1371_vm1, %v2010_v19 }
 0x6b4   : > { %3728 = vmatprep.mubr.msk.bf16.mxu1 %vm4750_vm0, %v4749_v0  ;;  %3725 = vmatpush3.bf16.msra.mxu1 %v4096_v28  ;;  %v3535_v28 = vld [vmem:[#allocation13] ss:$0 sm:$0xff] }
 0x6b5   : > { %3726 = vmatprep.subr.bf16.mxu1 %v4749_v0 }
 0x6b8   : > { %3727 = vmatpush3.bf16.msra.mxu1 %v4097_v31 }
 0x6b9   : > { %3740 = vmatprep.subr.bf16.mxu1 %v4749_v0 }
 0x6bb   : > { %3729 = vmatmul.mubr.msk.bf16.vlgmr.msra.gmra.mrb[24].mxu1 %vm1371_vm1, %v2196_v39 }
 0x6bc   : > { %3742 = vmatprep.mubr.msk.bf16.mxu1 %vm4750_vm0, %v4749_v0 }
 0x786   : > { %v2066_v21 = vpop.f32.mrb[20].mxu1 }
 0x787   : > { %v2067_v22 = vadd.f32 %v3521_v20, %v2066_v21  ;;  %v3714_v23 = vpop.f32.mrb[21].mxu1 }
 0x788   : > { %v2069_v24 = vpop.f32.mrb[22].mxu1 }
 0x789   : > { %v3715_v25 = vpop.f32.mrb[23].mxu1  ;;  %v2072_v26 = vadd.f32 %v2067_v22, %v5296_v5 }
 0x78b   : > { %v2073_v27 = vsel %vm1371_vm1, %v2072_v26, 0.0 }
 0x78c   : > { %2074 = vadd.xlane.f32.xlu0 %v2073_v27 }
 0x78e   : > { %v2252_v54 = vpop.f32.mrb[24].mxu1 }
 0x78f   : > { %v2253_v55 = vadd.f32 %v3531_v53, %v2252_v54  ;;  %v3730_v56 = vpop.f32.mrb[25].mxu1 }
 0x790   : > { %v2255_v57 = vpop.f32.mrb[26].mxu1 }
 0x791   : > { %v2256_v58 = vadd.f32 %v3531_v53, %v2255_v57  ;;  %v3731_v59 = vpop.f32.mrb[27].mxu1 }
 0x793   : > { %v4058_v60 = vpack.i.bf16 %v2256_v58, %v2253_v55  ;;  %v2373_v61 = vpack.c.bf16 %v2256_v58, %v2253_v55 }
 0x795   : > { %v2382_v62 = vsel %vm1571_vm2, %v2373_v61, 0 }
 0x796   : > { %3741 = vmatpush3.bf16.xpose.msra.mxu1 %v2382_v62 }
 0x797   : > { %3752 = vmatprep.subr.bf16.mxu1 %v4749_v0 }
 0x7a2   : > { %2103 = vperm.xlu0 %4057, %v1328_v30  }
 0x819   : > { %v2075_v32 = vpop.xlane.xlu0 %2074 }
 0x81a   : > { %v2077_v5 = vmul.f32 0.03125, %v2075_v32 }
 0x81c   : > { %v2078_v33 = vsub.f32 %v2072_v26, %v2077_v5 }
 0x81e   : > { %v2079_v34 = vmul.f32 %v2078_v33, %v2078_v33 }
 0x820   : > { %v2080_v35 = vsel %vm1371_vm1, %v2079_v34, 0.0 }
 0x821   : > { %2081 = vadd.xlane.f32.xlu1 %v2080_v35  ;;  %v5428_v49 = vpop.permute.xlu0 %2103 }
 0x832   : > { %4059 = vrot.lane.b32.xlu1 %v4058_v60, %s5697_s16 }
 0x836   : > { %4064 = vrot.lane.b32.xlu1 %v4058_v60, %s5698_s20 }
 0x83a   : > { %4069 = vrot.lane.b32.xlu1 %v4058_v60, %s5699_s22 }
 0x8ae   : > { %v2082_v41 = vpop.xlane.xlu1 %2081 }
 0x8af   : > { %v2083_v42 = vmul.f32 0.03125, %v2082_v41 }
 0x8b1   : > { %v2084_v43 = vadd.f32 1e-05, %v2083_v42 }
 0x8b2   : > { %v4060_v2 = vpop.permute.xlu1 %4059 }
 0x8b3   : > { %4126 = vrsqrt.f32 %v2084_v43  ;;  %v4062_v3 = vunpack.i.h.bf16 %v4060_v2  ;;  %v4061_v4 = vunpack.i.l.bf16 %v4060_v2 }
 0x8b5   : > { %v2374_v6 = vpack.c.bf16 %v4062_v3, %v4061_v4 }
 0x8b6   : > { %v4065_v8 = vpop.permute.xlu1 %4064 }
 0x8b7   : > { %v2428_v7 = vsel %vm1571_vm2, %v2374_v6, 0  ;;  %v4067_v9 = vunpack.i.h.bf16 %v4065_v8  ;;  %v4066_v10 = vunpack.i.l.bf16 %v4065_v8 }
 0x8b9   : > { %v2375_v15 = vpack.c.bf16 %v4067_v9, %v4066_v10 }
 0x8ba   : > { %v4070_v25 = vpop.permute.xlu1 %4069 }
 0x8bb   : > { %v2474_v20 = vsel %vm1571_vm2, %v2375_v15, 0  ;;  %v4072_v26 = vunpack.i.h.bf16 %v4070_v25  ;;  %v4071_v27 = vunpack.i.l.bf16 %v4070_v25 }
 0x8bd   : > { %v4127_v44 = vpop.eup %4126  ;;  %v2376_v29 = vpack.c.bf16 %v4072_v26, %v4071_v27 }
 0x8be   : > { %v2086_v46 = vmul.f32 %v4127_v44, %v2078_v33 }
 0x8bf   : > { %v2520_v33 = vsel %vm1571_vm2, %v2376_v29, 0 }
 0x8c0   : > { %v2093_v48 = vmul.f32 %v3525_v45, %v2086_v46 }
 0x8c2   : > { %v2100_v50 = vadd.f32 %v3526_v47, %v2093_v48 }
 0x8c4   : > { %v5431_v51 = vmul.f32 %v5428_v49, %v2100_v50 }
 0x8c6   : > { %v2134_v52 = vpack.c.bf16 %v5431_v51, %v5431_v51 }
 0x8c8   : > { %3721 = vmatmul.mubr.msk.bf16.vlgmr.msra.gmra.mrb[24].mxu0 %vm1371_vm1, %v2134_v52 }
 0x8c9   : > { %3736 = vmatprep.mubr.msk.bf16.mxu0 %vm4750_vm0, %v4749_v0  ;;  %3733 = vmatpush3.bf16.msra.mxu0 %v4100_v63 }
 0x8ca   : > { %3734 = vmatprep.subr.bf16.mxu0 %v4749_v0 }
 0x8cd   : > { %3735 = vmatpush3.bf16.msra.mxu0 %v4101_v1 }
 0x8ce   : > { %3746 = vmatprep.subr.bf16.mxu0 %v4749_v0 }
 0x8d0   : > { %3737 = vmatmul.mubr.msk.bf16.vlgmr.msra.gmra.mrb[28].mxu0 %vm1371_vm1, %v2196_v39 }
 0x8d1   : > { %3748 = vmatprep.mubr.msk.bf16.mxu0 %vm4750_vm0, %v4749_v0 }
 0x8d6   : > { %3747 = vmatpush3.bf16.xpose.msra.mxu0 %v2428_v7 }
 0x8d7   : > { %3758 = vmatprep.subr.bf16.mxu0 %v4749_v0 }
 0x99b   : > { %v2190_v12 = vpop.f32.mrb[24].mxu0 }
 0x99c   : > { %v2191_v13 = vadd.f32 %v3527_v11, %v2190_v12  ;;  %v3722_v14 = vpop.f32.mrb[25].mxu0 }
 0x99d   : > { %v2193_v16 = vpop.f32.mrb[26].mxu0 }
 0x99e   : > { %v2318_v17 = vmul.f32 0.35355338, %v2191_v13  ;;  %v3723_v18 = vpop.f32.mrb[27].mxu0 }
 0x9a0   : > { %v2369_v19 = vpack.c.bf16 %v2318_v17, %v2318_v17  ;;  %2320 = vrot.lane.b32.xlu1 %v2318_v17, %s5697_s16 }
 0x9a2   : > { %3743 = vmatmul.mubr.msk.bf16.vlgmr.msra.gmra.mrb[28].mxu1 %vm1571_vm2, %v2369_v19 }
 0x9a3   : > { %3753 = vmatpush3.bf16.xpose.msra.mxu1 %v2474_v20  ;;  %3754 = vmatprep.mubr.msk.bf16.mxu1 %vm4750_vm0, %v4749_v0  ;;  %v2311_v21 = vpop.f32.mrb[28].mxu0 }
 0x9a4   : > { %2323 = vrot.lane.b32.xlu1 %v2318_v17, %s5698_s20  ;;  %3764 = vmatprep.subr.bf16.mxu1 %v4749_v0  ;;  %v3738_v22 = vpop.f32.mrb[29].mxu0  ;;  %v5458_v31 = vadd.f32 %v3535_v28, %v2311_v21 }
 0x9a5   : > { %v2314_v23 = vpop.f32.mrb[30].mxu0 }
 0x9a6   : > { %v3739_v24 = vpop.f32.mrb[31].mxu0  ;;  %v5460_v32 = vadd.f32 %v3535_v28, %v2314_v23 }
 0x9a8   : > { %2326 = vrot.lane.b32.xlu1 %v2318_v17, %s5699_s22  ;;  %v2610_v35 = vpack.c.bf16 %v5460_v32, %v5458_v31  ;;  %v4078_v20 = vpack.i.bf16 %v5460_v32, %v5458_v31 }
 0xa12   : > { %v2321_v30 = vpop.permute.xlu1 %2320 }
 0xa13   : > { %v2370_v5 = vpack.c.bf16 %v2321_v30, %v2321_v30 }
 0xa15   : > { %3749 = vmatmul.mubr.msk.bf16.vlgmr.msra.gmra.mrb[32].mxu0 %vm1571_vm2, %v2370_v5 }
 0xa16   : > { %3759 = vmatpush3.bf16.xpose.msra.mxu0 %v2520_v33  ;;  %v2324_v34 = vpop.permute.xlu1 %2323  ;;  %3760 = vmatprep.mubr.msk.bf16.mxu0 %vm4750_vm0, %v4749_v0 }
 0xa17   : > { %v2371_v36 = vpack.c.bf16 %v2324_v34, %v2324_v34  ;;  %3770 = vmatprep.subr.bf16.mxu0 %v4749_v0 }
 0xa19   : > { %3755 = vmatmul.mubr.msk.bf16.vlgmr.msra.gmra.mrb[32].mxu1 %vm1571_vm2, %v2371_v36 }
 0xa1a   : > { %v2327_v38 = vpop.permute.xlu1 %2326  ;;  %3765 = vmatpush3.bf16.msra.mxu1 %v2610_v35  ;;  %3766 = vmatprep.mubr.msk.bf16.mxu1 %vm4750_vm0, %v4749_v0 }
 0xa1b   : > { %v2372_v39 = vpack.c.bf16 %v2327_v38, %v2327_v38  ;;  %3776 = vmatprep.subr.bf16.mxu1 %v4749_v0 }
 0xa1d   : > { %3761 = vmatmul.mubr.msk.bf16.vlgmr.msra.gmra.mrb[36].mxu0 %vm1571_vm2, %v2372_v39 }
 0xa1e   : > { %3772 = vmatprep.mubr.msk.bf16.mxu0 %vm4750_vm0, %v4749_v0 }
 0xa75   : > { %v2418_v41 = vpop.f32.mrb[28].mxu1 }
 0xa76   : > { %v2419_v42 = vadd.f32 %v2418_v41, %v2377_v37  ;;  %v3744_v43 = vpop.f32.mrb[29].mxu1 }
 0xa77   : > { %v2421_v44 = vpop.f32.mrb[30].mxu1 }
 0xa78   : > { %v3745_v45 = vpop.f32.mrb[31].mxu1  ;;  %v2562_v46 = vsel %vm2006_vm4, %v2419_v42, -inf }
 0xa79   : > { %2563 = vmax.xlane.f32.xlu1 %v2562_v46 }
 0xae8   : > { %v2464_v47 = vpop.f32.mrb[32].mxu0 }
 0xae9   : > { %v2465_v48 = vadd.f32 %v2464_v47, %v2377_v37  ;;  %v3750_v50 = vpop.f32.mrb[33].mxu0 }
 0xaea   : > { %v2467_v52 = vpop.f32.mrb[34].mxu0 }
 0xaeb   : > { %v3751_v53 = vpop.f32.mrb[35].mxu0  ;;  %v2565_v54 = vsel %vm2006_vm4, %v2465_v48, -inf }
 0xaec   : > { %v2510_v55 = vpop.f32.mrb[32].mxu1  ;;  %2566 = vmax.xlane.f32.xlu0 %v2565_v54 }
 0xaed   : > { %v2511_v56 = vadd.f32 %v2510_v55, %v2377_v37  ;;  %v3756_v57 = vpop.f32.mrb[33].mxu1 }
 0xaee   : > { %v2513_v58 = vpop.f32.mrb[34].mxu1 }
 0xaef   : > { %v3757_v59 = vpop.f32.mrb[35].mxu1  ;;  %v2568_v60 = vsel %vm2006_vm4, %v2511_v56, -inf }
 0xaf0   : > { %2569 = vmax.xlane.f32.xlu0 %v2568_v60  ;;  %v2556_v61 = vpop.f32.mrb[36].mxu0  ;;  %v4102_v59 = vld [vmem:[#allocation14] sm:$0xff]  }
 0xaf1   : > { %v2557_v62 = vadd.f32 %v2556_v61, %v2377_v37  ;;  %v3762_v63 = vpop.f32.mrb[37].mxu0 }
 0xaf2   : > { %v2559_v1 = vpop.f32.mrb[38].mxu0 }
 0xaf3   : > { %v3763_v2 = vpop.f32.mrb[39].mxu0  ;;  %v2571_v3 = vsel %vm2006_vm4, %v2557_v62, -inf }
 0xaf4   : > { %2572 = vmax.xlane.f32.xlu1 %v2571_v3 }
 0xb06   : > { %v2564_v4 = vpop.xlane.xlu1 %2563 }
 0xb07   : > { %v2574_v6 = vsub.f32 %v2419_v42, %v2564_v4 }
 0xb09   : > { %v2578_v7 = vmul.f32 1.442695, %v2574_v6  ;;  %v4103_v6 = vld [vmem:[#allocation14 + $0x8] sm:$0xff]  }
 0xb0b   : > { %4128 = vpow2.f32 %v2578_v7 }
 0xb15   : > { %v4129_v8 = vpop.eup %4128 }
 0xb16   : > { %v2586_v9 = vsel %vm2006_vm4, %v4129_v8, 0.0 }
 0xb17   : > { %2587 = vadd.xlane.f32.xlu0 %v2586_v9 }
 0xb79   : > { %v2567_v10 = vpop.xlane.xlu0 %2566 }
 0xb7a   : > { %v2575_v11 = vsub.f32 %v2465_v48, %v2567_v10 }
 0xb7c   : > { %v2580_v12 = vmul.f32 1.442695, %v2575_v11 }
 0xb7d   : > { %v2570_v13 = vpop.xlane.xlu0 %2569 }
 0xb7e   : > { %4130 = vpow2.f32 %v2580_v12  ;;  %v2576_v14 = vsub.f32 %v2511_v56, %v2570_v13 }
 0xb80   : > { %v2582_v15 = vmul.f32 1.442695, %v2576_v14 }
 0xb81   : > { %v2573_v22 = vpop.xlane.xlu1 %2572 }
 0xb82   : > { %4132 = vpow2.f32 %v2582_v15  ;;  %v2577_v23 = vsub.f32 %v2557_v62, %v2573_v22 }
 0xb84   : > { %v2584_v24 = vmul.f32 1.442695, %v2577_v23 }
 0xb88   : > { %v4131_v16 = vpop.eup %4130 }
 0xb89   : > { %v2589_v17 = vsel %vm2006_vm4, %v4131_v16, 0.0 }
 0xb8a   : > { %2590 = vadd.xlane.f32.xlu1 %v2589_v17 }
 0xb8c   : > { %v4133_v18 = vpop.eup %4132 }
 0xb8d   : > { %v2592_v19 = vsel %vm2006_vm4, %v4133_v18, 0.0 }
 0xb8e   : > { %2593 = vadd.xlane.f32.xlu0 %v2592_v19 }
 0xb9b   : > { %4079 = vrot.lane.b32.xlu1 %v4078_v20, %s5698_s20  ;;  %s5704_s20 = smov 24  }
 0xba4   : > { %4074 = vrot.lane.b32.xlu0 %v4078_v20, %s5697_s16  ;;  %v2588_v21 = vpop.xlane.xlu0 %2587  ;;  %s5703_s16 = smov 16  }
 0xba5   : > { %4134 = vrcp.f32 %v2588_v21 }
 0xba6   : > { %4136 = vpow2.f32 %v2584_v24 }
 0xbaf   : > { %v4135_v25 = vpop.eup %4134 }
 0xbb0   : > { %v2602_v26 = vmul.f32 %v4135_v25, %v4129_v8  ;;  %v4137_v28 = vpop.eup %4136 }
 0xbb1   : > { %v2595_v29 = vsel %vm2006_vm4, %v4137_v28, 0.0 }
 0xbb2   : > { %2892 = vst.msk [vmem:[%s5491_s29] sm:$0xff] %vm2006_vm4, %v2602_v26  ;;  %v2606_v27 = vpack.c.bf16 %v2602_v26, %v2602_v26 }
 0xbb4   : > { %3767 = vmatmul.mubr.msk.bf16.vlgmr.msra.gmra.mrb[36].mxu1 %vm2006_vm4, %v2606_v27 }
 0xbb5   : > { %3778 = vmatprep.mubr.msk.bf16.mxu1 %vm4750_vm0, %v4749_v0 }
 0xbbf   : > { %2596 = vadd.xlane.f32.xlu1 %v2595_v29 }
 0xbd0   : > { %4084 = vrot.lane.b32.xlu1 %v4078_v20, %s5699_s22  ;;  %s5705_s22 = sld [smem:[#allocation59_spill]] }
 0xc17   : > { %v2591_v30 = vpop.xlane.xlu1 %2590 }
 0xc18   : > { %4138 = vrcp.f32 %v2591_v30 }
 0xc1b   : > { %v2594_v31 = vpop.xlane.xlu0 %2593  ;;  %v4080_v32 = vpop.permute.xlu1 %4079 }
 0xc1c   : > { %4140 = vrcp.f32 %v2594_v31  ;;  %v4082_v5 = vunpack.i.h.bf16 %v4080_v32  ;;  %v4081_v33 = vunpack.i.l.bf16 %v4080_v32  ;;  %v4104_v31 = vld [vmem:[#allocation20] sm:$0xff]   ;;  %v4105_v32 = vld [vmem:[#allocation20 + $0x8] sm:$0xff]  }
 0xc1e   : > { %v2612_v34 = vpack.c.bf16 %v4082_v5, %v4081_v33  ;;  %v4106_v5 = vld [vmem:[%s5705_s22] sm:$0xff]  }
 0xc1f   : > { %v4075_v35 = vpop.permute.xlu0 %4074 }
 0xc20   : > { %v4077_v36 = vunpack.i.h.bf16 %v4075_v35  ;;  %v4076_v38 = vunpack.i.l.bf16 %v4075_v35  ;;  %3777 = vmatpush3.bf16.msra.mxu1 %v2612_v34 }
 0xc21   : > { %3788 = vmatprep.subr.bf16.mxu1 %v4749_v0 }
 0xc22   : > { %v4139_v39 = vpop.eup %4138  ;;  %v2611_v40 = vpack.c.bf16 %v4077_v36, %v4076_v38  ;;  %v3551_v38 = vld [vmem:[#allocation17] ss:$0 sm:$0xff] }
 0xc23   : > { %v2603_v37 = vmul.f32 %v4139_v39, %v4131_v16 }
 0xc24   : > { %3771 = vmatpush3.bf16.msra.mxu0 %v2611_v40  ;;  %v3552_v40 = vld [vmem:[#allocation19] ss:$0 sm:$0xff] }
 0xc25   : > { %2893 = vst.msk [vmem:[%s5491_s29 + $0x8] sm:$0xff] %vm2006_vm4, %v2603_v37  ;;  %v2607_v41 = vpack.c.bf16 %v2603_v37, %v2603_v37  ;;  %3782 = vmatprep.subr.bf16.mxu0 %v4749_v0 }
 0xc26   : > { %v4141_v42 = vpop.eup %4140 }
 0xc27   : > { %v2604_v43 = vmul.f32 %v4141_v42, %v4133_v18  ;;  %3773 = vmatmul.mubr.msk.bf16.vlgmr.msra.gmra.mrb[40].mxu0 %vm2006_vm4, %v2607_v41  ;;  %v3547_v18 = vld [vmem:[#allocation16] ss:$0 sm:$0xff] }
 0xc28   : > { %3784 = vmatprep.mubr.msk.bf16.mxu0 %vm4750_vm0, %v4749_v0 }
 0xc29   : > { %2894 = vst.msk [vmem:[%s5491_s29 + $0x10] sm:$0xff] %vm2006_vm4, %v2604_v43  ;;  %v2608_v44 = vpack.c.bf16 %v2604_v43, %v2604_v43 }
 0xc2b   : > { %3779 = vmatmul.mubr.msk.bf16.vlgmr.msra.gmra.mrb[40].mxu1 %vm2006_vm4, %v2608_v44  ;;  %v4108_v44 = vld [vmem:[%s5705_s22 + $0x10] sm:$0xff]  }
 0xc2c   : > { %3792 = vmatprep.mubr.msk.bf16.mxu1 %vm4750_vm0, %v4749_v0  ;;  %3789 = vmatpush3.bf16.msra.mxu1 %v4102_v59 }
 0xc2d   : > { %3790 = vmatprep.subr.bf16.mxu1 %v4749_v0 }
 0xc30   : > { %3791 = vmatpush3.bf16.msra.mxu1 %v4103_v6 }
 0xc31   : > { %3804 = vmatprep.subr.bf16.mxu1 %v4749_v0 }
 0xc4c   : > { %v2597_v45 = vpop.xlane.xlu1 %2596 }
 0xc4d   : > { %4142 = vrcp.f32 %v2597_v45  ;;  %v4109_v45 = vld [vmem:[%s5705_s22 + $0x18] sm:$0xff]  }
 0xc50   : > { %v4085_v46 = vpop.permute.xlu1 %4084 }
 0xc51   : > { %v4087_v47 = vunpack.i.h.bf16 %v4085_v46  ;;  %v4086_v48 = vunpack.i.l.bf16 %v4085_v46  ;;  %v3553_v46 = vld [vmem:[#allocation22] ss:$0 sm:$0xff] }
 0xc53   : > { %v2613_v50 = vpack.c.bf16 %v4087_v47, %v4086_v48 }
 0xc55   : > { %3783 = vmatpush3.bf16.msra.mxu0 %v2613_v50 }
 0xc56   : > { %3796 = vmatprep.subr.bf16.mxu0 %v4749_v0 }
 0xc57   : > { %v4143_v52 = vpop.eup %4142 }
 0xc58   : > { %v2605_v53 = vmul.f32 %v4143_v52, %v4137_v28 }
 0xc5a   : > { %2895 = vst.msk [vmem:[%s5491_s29 + $0x18] sm:$0xff] %vm2006_vm4, %v2605_v53  ;;  %v2609_v54 = vpack.c.bf16 %v2605_v53, %v2605_v53  ;;  %s5707_s29 = sshll.u32 %s5231_s8, 3 }
 0xc5c   : > { %3785 = vmatmul.mubr.msk.bf16.vlgmr.msra.gmra.mrb[44].mxu0 %vm2006_vm4, %v2609_v54 }
 0xc5d   : > { %3800 = vmatprep.mubr.msk.bf16.mxu0 %vm4750_vm0, %v4749_v0  ;;  %3797 = vmatpush3.bf16.msra.mxu0 %v4104_v31 }
 0xc5e   : > { %3798 = vmatprep.subr.bf16.mxu0 %v4749_v0 }
 0xc61   : > { %3799 = vmatpush3.bf16.msra.mxu0 %v4105_v32 }
 0xc87   : > { %v2651_v55 = vpop.f32.mrb[36].mxu1 }
 0xc88   : > { %v3768_v56 = vpop.f32.mrb[37].mxu1 }
 0xc89   : > { %v2654_v57 = vpop.f32.mrb[38].mxu1  ;;  %v3557_v56 = vld [vmem:[#allocation23] ss:$0 sm:$0xff] }
 0xc8a   : > { %v3769_v58 = vpop.f32.mrb[39].mxu1 }
 0xcfa   : > { %v2694_v60 = vpop.f32.mrb[40].mxu0 }
 0xcfb   : > { %2787 = vrot.lane.b32.xlu0 %v2694_v60, %s5702_s26  ;;  %v3774_v61 = vpop.f32.mrb[41].mxu0  ;;  %s1282_s26 = scalar_lea.vmem [#allocation28], %s5707_s29  ;;  %s4602_s29 = sshll.u32 %s4758_s18, 4  ;;  %s4603_s29 = int_to_ptr.vmem [resolvable:$false] %s4602_s29 }
 0xcfc   : > { %v2697_v62 = vpop.f32.mrb[42].mxu0  ;;  %s4604_s9 = scalar_lea.vmem %s4603_s29, 256 }
 0xcfd   : > { %v3775_v63 = vpop.f32.mrb[43].mxu0 }
 0xcfe   : > { %v2737_v1 = vpop.f32.mrb[40].mxu1 }
 0xcff   : > { %2791 = vrot.lane.b32.xlu1 %v2737_v1, %s5703_s16  ;;  %v3780_v2 = vpop.f32.mrb[41].mxu1  ;;  %s3104_s16 = sshll.u32 %s1282_s26, 4  ;;  %s5551_s16 = int_to_ptr.vmem [resolvable:$true] %s3104_s16 }
 0xd00   : > { %v2740_v3 = vpop.f32.mrb[42].mxu1  ;;  %s4598_s6 = scalar_lea.vmem %s5551_s16, 128  ;;  %p4605_p13 = scmp.lt.s32.totalorder %s5551_s16, %s4603_s29 }
 0xd01   : > { %v3781_v4 = vpop.f32.mrb[43].mxu1  ;;  %p4599_p8 = scmp.ne.s32.totalorder %s5551_s16, %s4598_s6  ;;  %p4606_p5 = scmp.lt.s32.totalorder %s4604_s9, %s4598_s6 }
 0xd03   : > { %p4600_p10 = pnand %p4599_p8, %p5708_p9  ;;  %p4607_p7 = por %p4606_p5, %p4605_p13 }
 0xd05   : > { %p4601_p12 = pneg %p4600_p10 }
 0xd07   : > { %p4608_p1 = pnand %p4607_p7, %p4601_p12 }
 0xd2f   : > { %v2780_v7 = vpop.f32.mrb[44].mxu0 }
 0xd30   : > { %2795 = vrot.lane.b32.xlu0 %v2780_v7, %s5704_s20  ;;  %v3786_v8 = vpop.f32.mrb[45].mxu0  ;;  %s5549_s20 = scalar_lea.hbm %s5706_s3, %s3566_s1 }
 0xd31   : > { %v2783_v9 = vpop.f32.mrb[46].mxu0 }
 0xd32   : > { %v3787_v10 = vpop.f32.mrb[47].mxu0 }
 0xd33   : > { %v3563_v10 = vld [vmem:[#allocation25] ss:$0 sm:$0xff] }
 0xd6d   : > { %v2788_v11 = vpop.permute.xlu0 %2787 }
 0xd6e   : > { %v2798_v13 = vsel %vm1571_vm2, %v2651_v55, %v2788_v11 }
 0xd71   : > { %v2792_v12 = vpop.permute.xlu1 %2791 }
 0xd72   : > { %v2799_v14 = vsel %vm2006_vm4, %v2798_v13, %v2792_v12  ;;  %v3564_v12 = vld [vmem:[#allocation26] ss:$0 sm:$0xff] }
 0xda2   : > { %v2796_v15 = vpop.permute.xlu0 %2795 }
 0xda3   : > { %v2800_v16 = vsel %vm2008_vm5, %v2799_v14, %v2796_v15 }
 0xda4   : > { %v2801_v17 = vpack.c.bf16 %v2800_v16, %v2800_v16 }
 0xda6   : > { %3793 = vmatmul.mubr.msk.bf16.vlgmr.msra.gmra.mrb[44].mxu1 %vm1371_vm1, %v2801_v17 }
 0xda7   : > { %3812 = vmatprep.mubr.msk.bf16.mxu1 %vm4750_vm0, %v4749_v0  ;;  %3805 = vmatpush3.bf16.msra.mxu1 %v4106_v5 }
 0xda8   : > { %3806 = vmatprep.subr.bf16.mxu1 %v4749_v0 }
 0xe79   : > { %v2857_v19 = vpop.f32.mrb[44].mxu1 }
 0xe7a   : > { %v2858_v20 = vadd.f32 %v3547_v18, %v2857_v19  ;;  %v3794_v21 = vpop.f32.mrb[45].mxu1 }
 0xe7b   : > { %v2860_v22 = vpop.f32.mrb[46].mxu1 }
 0xe7c   : > { %v3795_v23 = vpop.f32.mrb[47].mxu1  ;;  %v2863_v24 = vadd.f32 %v2858_v20, %v5431_v51  ;;  %v4107_v51 = vld [vmem:[%s5705_s22 + $0x8] sm:$0xff]  }
 0xe7d   : > { %3807 = vmatpush3.bf16.msra.mxu1 %v4107_v51 }
 0xe7e   : > { %v2864_v25 = vsel %vm1371_vm1, %v2863_v24, 0.0  ;;  %3808 = vmatprep.subr.bf16.mxu1 %v4749_v0 }
 0xe7f   : > { %2865 = vadd.xlane.f32.xlu1 %v2864_v25 }
 0xe81   : > { %3809 = vmatpush3.bf16.msra.mxu1 %v4108_v44 }
 0xe82   : > { %3810 = vmatprep.subr.bf16.mxu1 %v4749_v0 }
 0xe85   : > { %3811 = vmatpush3.bf16.msra.mxu1 %v4109_v45 }
 0xf0c   : > { %v2866_v26 = vpop.xlane.xlu1 %2865 }
 0xf0d   : > { %v2867_v27 = vmul.f32 0.03125, %v2866_v26 }
 0xf0f   : > { %v2868_v28 = vsub.f32 %v2863_v24, %v2867_v27 }
 0xf11   : > { %v2869_v29 = vmul.f32 %v2868_v28, %v2868_v28 }
 0xf13   : > { %v2870_v30 = vsel %vm1371_vm1, %v2869_v29, 0.0 }
 0xf14   : > { %2871 = vadd.xlane.f32.xlu0 %v2870_v30 }
 0xfa1   : > { %v2872_v33 = vpop.xlane.xlu0 %2871 }
 0xfa2   : > { %v2873_v34 = vmul.f32 0.03125, %v2872_v33 }
 0xfa4   : > { %v2874_v35 = vadd.f32 1e-05, %v2873_v34 }
 0xfa6   : > { %4144 = vrsqrt.f32 %v2874_v35 }
 0xfb0   : > { %v4145_v36 = vpop.eup %4144 }
 0xfb1   : > { %v2876_v39 = vmul.f32 %v4145_v36, %v2868_v28 }
 0xfb3   : > { %v2883_v37 = vmul.f32 %v3551_v38, %v2876_v39 }
 0xfb5   : > { %v2890_v41 = vadd.f32 %v3552_v40, %v2883_v37 }
 0xfb7   : > { %v2891_v42 = vmul.f32 %v2890_v41, %v5428_v49 }
 0xfb9   : > { %v2896_v43 = vpack.c.bf16 %v2891_v42, %v2891_v42 }
 0xfbb   : > { %3801 = vmatmul.mubr.msk.bf16.vlgmr.msra.gmra.mrb[48].mxu0 %vm1371_vm1, %v2896_v43 }
0x108e   : > { %v2957_v47 = vpop.f32.mrb[48].mxu0 }
0x108f   : > { %v2958_v48 = vadd.f32 %v3553_v46, %v2957_v47  ;;  %v3802_v50 = vpop.f32.mrb[49].mxu0 }
0x1090   : > { %v2960_v52 = vpop.f32.mrb[50].mxu0 }
0x1091   : > { %v2963_v53 = vmax.f32 %v2958_v48, 0.0  ;;  %v3803_v54 = vpop.f32.mrb[51].mxu0 }
0x1093   : > { %v2964_v55 = vpack.c.bf16 %v2963_v53, %v2963_v53 }
0x1095   : > { %3813 = vmatmul.mubr.msk.bf16.vlgmr.msra.gmra.mrb[48].mxu1 %vm3004_vm6, %v2964_v55 }
0x1168   : > { %v3042_v57 = vpop.f32.mrb[48].mxu1 }
0x1169   : > { %v3043_v58 = vadd.f32 %v3557_v56, %v3042_v57  ;;  %v3814_v59 = vpop.f32.mrb[49].mxu1 }
0x116a   : > { %v3045_v60 = vpop.f32.mrb[50].mxu1 }
0x116b   : > { %v3815_v61 = vpop.f32.mrb[51].mxu1  ;;  %v3048_v62 = vadd.f32 %v3043_v58, %v2891_v42 }
0x116d   : > { %v3051_v0 = vsel %vm1371_vm1, %v3048_v62, 0.0 }
0x116e   : > { %3052 = vadd.xlane.f32.xlu0 %v3051_v0 }
0x11fb   : > { %v3053_v63 = vpop.xlane.xlu0 %3052 }
0x11fc   : > { %v3054_v1 = vmul.f32 0.03125, %v3053_v63 }
0x11fe   : > { %v3055_v2 = vsub.f32 %v3048_v62, %v3054_v1 }
0x1200   : > { %v3056_v3 = vmul.f32 %v3055_v2, %v3055_v2 }
0x1202   : > { %v3057_v4 = vsel %vm1371_vm1, %v3056_v3, 0.0 }
0x1203   : > { %3058 = vadd.xlane.f32.xlu1 %v3057_v4 }
0x1290   : > { %v3059_v6 = vpop.xlane.xlu1 %3058 }
0x1291   : > { %v3060_v7 = vmul.f32 0.03125, %v3059_v6 }
0x1293   : > { %v3061_v8 = vadd.f32 1e-05, %v3060_v7 }
0x1295   : > { %4146 = vrsqrt.f32 %v3061_v8 }
0x129f   : > { %v4147_v9 = vpop.eup %4146 }
0x12a0   : > { %v3063_v11 = vmul.f32 %v4147_v9, %v3055_v2 }
0x12a2   : > { %v3070_v13 = vmul.f32 %v3563_v10, %v3063_v11 }
0x12a4   : > { %v3077_v14 = vadd.f32 %v3564_v12, %v3070_v13 }
0x12a6   : > { %v3078_v15 = vmul.f32 %v3077_v14, %v5428_v49 }
0x12a8   : > { %3079 = vst.msk [vmem:[%s1282_s26] sm:$0xff] %vm1371_vm1, %v3078_v15 }
0x12a9   : > { %4611 = shalt.err (!%p4608_p1)
}
0x12aa   : > { %s4612_s8 = scalar_lea.hbm %s5549_s20, 128  ;;  %s4616_s1 = scalar_lea.hbm %s5706_s3, 256 }
0x12ab   : > { %p4613_p3 = scmp.ne.s32.totalorder %s5549_s20, %s4612_s8  ;;  %p4617_p6 = scmp.lt.u32.totalorder %s5549_s20, %s5706_s3 }
0x12ac   : > { %p4618_p0 = scmp.lt.u32.totalorder %s4616_s1, %s4612_s8  ;;  %p4620_p8 = scmp.lt.u32.totalorder %s4612_s8, %s5549_s20 }
0x12ad   : > { %p4614_p4 = pnand %p4613_p3, %p5708_p9 }
0x12ae   : > { %p4619_p2 = por %p4618_p0, %p4617_p6 }
0x12af   : > { %p4615_p11 = pneg %p4614_p4 }
0x12b0   : > { %p4621_p10 = por %p4620_p8, %p4619_p2 }
0x12b2   : > { %p4622_p12 = pnand %p4621_p10, %p4615_p11 }
0x12b4   : > { %4625 = shalt.err (!%p4622_p12)
}
0x12b5   : > { %3878 = dma.vmem_to_hbm [thread:$0]  (%p5708_p9), %s5551_s16, 128, %s5549_s20, %s3081_s5  }
0x12b6 PF: > { %s3122_s9 = sand.u32 1, %s4684_s7   ;;  %p5709_p13 = scmp.ne.s32.totalorder %s5664_s17, 0 }
0x12b7   : > { %p5710_p5 = scmp.ge.s32.totalorder %s4696_s0, 2  ;;  %s3123_s6 = scalar_lea.sflag [#allocation4], %s3122_s9 }
0x12b9   : > { %p3931_p7 = pnand %p5710_p5, %p5709_p13 }
0x12bb   : > { %4679 = dma.done.wait (!%p3931_p7), %s3123_s6, 128  }
0x12bc   : > { %4681 = vsyncadd (!%p3931_p7), %s3123_s6, 4294967168  ;;  %p89_p1 = scmp.ge.s32.totalorder %s5167_s4, 4   ;;  %s5711_s7 = smov %s4688_s10 }
0x12bd   : > { %s5712_s10 = smov %s4692_s11  ;;  %s5713_s11 = smov %s5179_s15 }
0x12be   : > { %s5714_s0 = smov %s5167_s4  ;;  %91 = sbr.rel (!%p89_p1) target bundleno = 77 (0x4d), region = 318 }
0x12c5   :  { %3144 = vsyncpa [#allocation3], 1 }
0x12c6   :  { %3146 = vsyncpa [#allocation3 + $0x1], 1 }
0x12c7   :  { %3147 = vsyncpa [#allocation6], 1 }
0x12c8   :  { %3148 = vsyncpa [#allocation9], 1 }
0x12c9   :  { %3149 = vsyncpa [#allocation12], 1 }
0x12ca   :  { %3150 = vsyncpa [#allocation15], 1 }
0x12cb   :  { %3151 = vsyncpa [#allocation18], 1 }
0x12cc   :  { %3152 = vsyncpa [#allocation21], 1 }
0x12cd   :  { %3153 = vsyncpa [#allocation24], 1 }
0x12ce   :  { %3154 = vsyncpa [#allocation27], 1 }
0x12cf   :  { %3155 = vsyncpa [#allocation4], 1 }
0x12d0   :  { %3157 = vsyncpa [#allocation4 + $0x1], 1 }

</bundles_post_ra>
